<compile_context>
chip_gen: v7x
topology: tpu7x:2x2x1
jax: 0.10.0
libtpu: 0.0.40
codegen_flags: <defaults>
</compile_context>

<pallas_src>
import math
import functools

import jax
import jax.numpy as jnp
from jax.experimental import pallas as pl
from jax.experimental.pallas import tpu as pltpu


def _attn_kernel(xq_ref, xkv_ref, wq_ref, bq_ref, wkv_ref, bkv_ref, wo_ref,
                 o_ref, q_scr, m_scr, l_scr, acc_scr,
                 *, n_heads, d_k, d_v, causal, q_blk, kv_blk):
    """One grid step: (batch b, q tile qi, kv tile ki) of flash attention.

    xq_ref : (1, q_blk, d_model)    xkv_ref : (1, kv_blk, d_model)
    wq_ref : (H, d_model, d_k)      bq_ref  : (H, 1, d_k)         (already 1/sqrt(d_k)-scaled)
    wkv_ref: (H, d_model, d_k+d_v)  bkv_ref : (H, 1, d_k+d_v)
    wo_ref : (H, d_v, d_model)      o_ref   : (1, q_blk, d_model)
    """
    qi = pl.program_id(1)
    ki = pl.program_id(2)
    n_kv = pl.num_programs(2)
    dm = xq_ref.shape[-1]

    @pl.when(ki == 0)
    def _init():
        # Q projection: computed once per (batch, q-tile), cached across kv steps.
        xq = jnp.broadcast_to(xq_ref[...], (n_heads, q_blk, dm))          # (H, tq, dm)
        q = jnp.einsum("hqd,hdk->hqk", xq, wq_ref[...],
                       preferred_element_type=jnp.float32) + bq_ref[...]
        q_scr[...] = q
        m_scr[...] = jnp.full(m_scr.shape, -jnp.inf, jnp.float32)
        l_scr[...] = jnp.zeros(l_scr.shape, jnp.float32)
        acc_scr[...] = jnp.zeros(acc_scr.shape, jnp.float32)

    def _update():
        # Fused K|V projection: one head-batched MXU pass per kv tile.
        xkv = jnp.broadcast_to(xkv_ref[...], (n_heads, kv_blk, dm))       # (H, tk, dm)
        kv = jnp.einsum("hkd,hde->hke", xkv, wkv_ref[...],
                        preferred_element_type=jnp.float32) + bkv_ref[...]
        k = kv[:, :, :d_k]                                                # (H, tk, d_k)
        v = kv[:, :, d_k:]                                                # (H, tk, d_v)

        # Head-batched scores, contracting on the last axes (no explicit K^T).
        s = jnp.einsum("hqc,hkc->hqk", q_scr[...], k,
                       preferred_element_type=jnp.float32)                # (H, tq, tk)

        if causal:
            # Built once per grid step (shared by all heads).  -inf matches torch's
            # (1 - 1/tril) additive mask; the diagonal is always unmasked so no row
            # of this module can be fully masked (no exp(-inf - -inf) NaN risk).
            row = jax.lax.broadcasted_iota(jnp.int32, (q_blk, kv_blk), 0) + qi * q_blk
            col = jax.lax.broadcasted_iota(jnp.int32, (q_blk, kv_blk), 1) + ki * kv_blk
            s = jnp.where((col <= row)[None, :, :], s, -jnp.inf)

        # Online softmax update.
        m_prev = m_scr[...]
        m_new = jnp.maximum(m_prev, jnp.max(s, axis=-1, keepdims=True))   # (H, tq, 1)
        alpha = jnp.exp(m_prev - m_new)
        p = jnp.exp(s - m_new)                                            # (H, tq, tk)
        l_scr[...] = alpha * l_scr[...] + jnp.sum(p, axis=-1, keepdims=True)
        acc_scr[...] = alpha * acc_scr[...] + jnp.einsum(
            "hqk,hkd->hqd", p, v, preferred_element_type=jnp.float32)
        m_scr[...] = m_new

    if causal:
        # Skip kv tiles that lie entirely above the diagonal for this q tile.
        pl.when(ki * kv_blk <= qi * q_blk + (q_blk - 1))(_update)
    else:
        _update()

    @pl.when(ki == n_kv - 1)
    def _finalize():
        # TODO(synk): approx=True would use the (otherwise idle) EUP slot; kept exact
        # so the script's correctness check stays tight against the f32 reference.
        inv_l = pl.reciprocal(l_scr[...], approx=False)
        ctx = acc_scr[...] * inv_l                                        # (H, tq, d_v)
        # Head-batched output projection; summing over heads == merge_heads + Linear.
        out = jnp.einsum("hqd,hdm->hqm", ctx, wo_ref[...],
                         preferred_element_type=jnp.float32)              # (H, tq, dm)
        o_ref[0] = jnp.sum(out, axis=0).astype(o_ref.dtype)


def attn_pallas(x, wq, bq, wk, bk, wv, bv, wo, *, n_heads, d_k, d_v,
                mask="none", block_q=128, block_kv=128, vmem_limit_mb=64):
    B, n, d_model = x.shape
    assert wq.shape == (d_model, n_heads * d_k) and wk.shape == (d_model, n_heads * d_k)
    assert wv.shape == (d_model, n_heads * d_v) and wo.shape == (n_heads * d_v, d_model)

    q_blk = min(block_q, n)
    kv_blk = min(block_kv, n)
    assert n % q_blk == 0 and n % kv_blk == 0, "sequence must divide block sizes"
    assert (q_blk % 8 == 0 or q_blk == n) and (kv_blk % 8 == 0 or kv_blk == n)

    f32 = jnp.float32
    scale = 1.0 / math.sqrt(d_k)

    # Head-major 3-D weights, prepared once in the wrapper (pure layout plumbing):
    # the 1/sqrt(d_k) scale is folded into Wq/bq, and Wk|Wv are fused so the kernel
    # issues a single K|V projection matmul per kv tile.
    wq3 = (wq * scale).reshape(d_model, n_heads, d_k).transpose(1, 0, 2).astype(f32)
    bq3 = (bq * scale).reshape(n_heads, 1, d_k).astype(f32)
    wk3 = wk.reshape(d_model, n_heads, d_k).transpose(1, 0, 2)
    wv3 = wv.reshape(d_model, n_heads, d_v).transpose(1, 0, 2)
    wkv3 = jnp.concatenate([wk3, wv3], axis=-1).astype(f32)               # (H, dm, dk+dv)
    bkv3 = jnp.concatenate([bk.reshape(n_heads, 1, d_k),
                            bv.reshape(n_heads, 1, d_v)], axis=-1).astype(f32)
    wo3 = wo.reshape(n_heads, d_v, d_model).astype(f32)                   # (H, dv, dm)

    kernel = functools.partial(
        _attn_kernel, n_heads=n_heads, d_k=d_k, d_v=d_v,
        causal=(mask == "causal"), q_blk=q_blk, kv_blk=kv_blk)

    n_q, n_kv = n // q_blk, n // kv_blk
    rep = lambda shape: pl.BlockSpec(shape, lambda b, qi, ki: (0,) * len(shape))

    flops = (2 * B * n * d_model * n_heads * (2 * d_k + d_v)      # QKV projections
             + 2 * B * n_heads * n * n * (d_k + d_v)              # scores + PV
             + 2 * B * n * n_heads * d_v * d_model)               # output projection
    bytes_accessed = 4 * (2 * B * n * d_model
                          + d_model * n_heads * (2 * d_k + d_v)
                          + n_heads * d_v * d_model
                          + n_heads * (2 * d_k + d_v))
    cost = pl.CostEstimate(flops=flops,
                           transcendentals=B * n_heads * n * n,
                           bytes_accessed=bytes_accessed)

    return pl.pallas_call(
        kernel,
        out_shape=jax.ShapeDtypeStruct((B, n, d_model), f32),
        grid_spec=pltpu.PrefetchScalarGridSpec(
            num_scalar_prefetch=0,
            grid=(B, n_q, n_kv),
            in_specs=[
                pl.BlockSpec((1, q_blk, d_model), lambda b, qi, ki: (b, qi, 0)),   # x (q tile)
                pl.BlockSpec((1, kv_blk, d_model), lambda b, qi, ki: (b, ki, 0)),  # x (kv tile)
                rep((n_heads, d_model, d_k)),                                      # Wq (scaled)
                rep((n_heads, 1, d_k)),                                            # bq (scaled)
                rep((n_heads, d_model, d_k + d_v)),                                # [Wk|Wv]
                rep((n_heads, 1, d_k + d_v)),                                      # [bk|bv]
                rep((n_heads, d_v, d_model)),                                      # Wo
            ],
            out_specs=pl.BlockSpec((1, q_blk, d_model), lambda b, qi, ki: (b, qi, 0)),
            scratch_shapes=[
                pltpu.VMEM((n_heads, q_blk, d_k), jnp.float32),   # cached scaled Q
                pltpu.VMEM((n_heads, q_blk, 1), jnp.float32),     # running row max
                pltpu.VMEM((n_heads, q_blk, 1), jnp.float32),     # running denominator
                pltpu.VMEM((n_heads, q_blk, d_v), jnp.float32),   # running PV accumulator
            ]),
        compiler_params=pltpu.CompilerParams(
            dimension_semantics=("parallel", "parallel", "arbitrary"),
            vmem_limit_bytes=vmem_limit_mb * 1024 * 1024),
        cost_estimate=cost,
    )(x.astype(f32), x.astype(f32), wq3, bq3, wkv3, bkv3, wo3)


def attn_reference(x, wq, bq, wk, bk, wv, bv, wo, *, n_heads, d_k, d_v, mask="none"):
    """Pure-JAX replica of the PyTorch forward (incl. the (1 - 1/tril) mask)."""
    B, n, d_model = x.shape
    q = x @ wq + bq
    k = x @ wk + bk
    v = x @ wv + bv
    split = lambda t, d: jnp.transpose(t.reshape(B, n, n_heads, d), (0, 2, 1, 3))
    Q, K, V = split(q, d_k), split(k, d_k), split(v, d_v)
    s = jnp.einsum("bhqd,bhkd->bhqk", Q / math.sqrt(d_k), K)
    if mask == "causal":
        tri = jnp.tril(jnp.ones((n, n), jnp.float32))
        s = s + (1.0 - 1.0 / tri)
    p = jax.nn.softmax(s, axis=-1)
    ctx = jnp.einsum("bhqk,bhkd->bhqd", p, V)
    ctx = jnp.transpose(ctx, (0, 2, 1, 3)).reshape(B, n, n_heads * d_v)
    return ctx @ wo


if __name__ == "__main__":
    # Small shapes consistent with the module: d_model=32, d_k=d_v=8, n_heads=4.
    # n_ctx=32 with 8-wide blocks exercises the multi-tile online-softmax path.
    B, n_ctx, d_model, n_heads, d_k, d_v = 2, 32, 32, 4, 8, 8

    key = jax.random.PRNGKey(0)
    ks = jax.random.split(key, 8)
    x  = jax.random.normal(ks[0], (B, n_ctx, d_model), jnp.float32)
    wq = jax.random.normal(ks[1], (d_model, n_heads * d_k), jnp.float32) * 0.1
    bq = jax.random.normal(ks[2], (n_heads * d_k,), jnp.float32) * 0.1
    wk = jax.random.normal(ks[3], (d_model, n_heads * d_k), jnp.float32) * 0.1
    bk = jax.random.normal(ks[4], (n_heads * d_k,), jnp.float32) * 0.1
    wv = jax.random.normal(ks[5], (d_model, n_heads * d_v), jnp.float32) * 0.1
    bv = jax.random.normal(ks[6], (n_heads * d_v,), jnp.float32) * 0.1
    wo = jax.random.normal(ks[7], (n_heads * d_v, d_model), jnp.float32) * 0.1

    for mask in ("none", "causal"):   # exercise both branches, incl. torch's (1 - 1/tril) mask
        out = attn_pallas(x, wq, bq, wk, bk, wv, bv, wo,
                          n_heads=n_heads, d_k=d_k, d_v=d_v, mask=mask,
                          block_q=8, block_kv=8)
        out = jax.block_until_ready(out)
        ref = attn_reference(x, wq, bq, wk, bk, wv, bv, wo,
                             n_heads=n_heads, d_k=d_k, d_v=d_v, mask=mask)
        assert out.shape == (B, n_ctx, d_model)
        assert jnp.allclose(out, ref, atol=2e-4, rtol=2e-4), f"mismatch vs reference ({mask})"

    print("KERNEL_OK")
</pallas_src>

<mosaic_0001>
module attributes {stable_mosaic.version = 11 : i64} {
  func.func @_attn_kernel(%arg0: i32, %arg1: i32, %arg2: i32, %arg3: memref<1x8x32xf32, #tpu.memory_space<vmem>>, %arg4: memref<1x8x32xf32, #tpu.memory_space<vmem>>, %arg5: memref<4x32x8xf32, #tpu.memory_space<vmem>>, %arg6: memref<4x1x8xf32, #tpu.memory_space<vmem>>, %arg7: memref<4x32x16xf32, #tpu.memory_space<vmem>>, %arg8: memref<4x1x16xf32, #tpu.memory_space<vmem>>, %arg9: memref<4x8x32xf32, #tpu.memory_space<vmem>>, %arg10: memref<1x8x32xf32, #tpu.memory_space<vmem>>, %arg11: memref<4x8x8xf32, #tpu.memory_space<vmem>>, %arg12: memref<4x8x1xf32, #tpu.memory_space<vmem>>, %arg13: memref<4x8x1xf32, #tpu.memory_space<vmem>>, %arg14: memref<4x8x8xf32, #tpu.memory_space<vmem>>) attributes {dimension_semantics = [#tpu.dimension_semantics<parallel>, #tpu.dimension_semantics<parallel>, #tpu.dimension_semantics<arbitrary>], iteration_bounds = array<i64: 2, 4, 4>, scalar_prefetch = 0 : i64, scratch_operands = 4 : i64, tpu.core_type = #tpu.core_type<tc>, window_params = [{transform_indices = @transform_0, window_bounds = array<i64: 1, 8, 32>}, {transform_indices = @transform_1, window_bounds = array<i64: 1, 8, 32>}, {pipeline_mode = #tpu.pipeline_mode<synchronous>, transform_indices = @transform_2, window_bounds = array<i64: 4, 32, 8>}, {pipeline_mode = #tpu.pipeline_mode<synchronous>, transform_indices = @transform_3, window_bounds = array<i64: 4, 1, 8>}, {pipeline_mode = #tpu.pipeline_mode<synchronous>, transform_indices = @transform_4, window_bounds = array<i64: 4, 32, 16>}, {pipeline_mode = #tpu.pipeline_mode<synchronous>, transform_indices = @transform_5, window_bounds = array<i64: 4, 1, 16>}, {pipeline_mode = #tpu.pipeline_mode<synchronous>, transform_indices = @transform_6, window_bounds = array<i64: 4, 8, 32>}, {transform_indices = @transform_7, window_bounds = array<i64: 1, 8, 32>}]} {
    %c0_i32 = arith.constant 0 : i32
    %0 = arith.cmpi eq, %arg2, %c0_i32 : i32
    %1 = arith.extui %0 : i1 to i32
    %c0_i32_0 = arith.constant 0 : i32
    %2 = arith.cmpi ne, %1, %c0_i32_0 : i32
    scf.if %2 {
      %c0_35 = arith.constant 0 : index
      %c0_36 = arith.constant 0 : index
      %c0_37 = arith.constant 0 : index
      %40 = vector.load %arg3[%c0_35, %c0_36, %c0_37] : memref<1x8x32xf32, #tpu.memory_space<vmem>>, vector<1x8x32xf32>
      %41 = vector.shape_cast %40 : vector<1x8x32xf32> to vector<1x8x32xf32>
      %42 = vector.broadcast %41 : vector<1x8x32xf32> to vector<4x8x32xf32>
      %c0_38 = arith.constant 0 : index
      %c0_39 = arith.constant 0 : index
      %c0_40 = arith.constant 0 : index
      %43 = vector.load %arg5[%c0_38, %c0_39, %c0_40] : memref<4x32x8xf32, #tpu.memory_space<vmem>>, vector<4x32x8xf32>
      "tpu.trace_start"() <{level = 10 : i32, message = "hqd,hdk->hqk"}> : () -> ()
      %cst_41 = arith.constant dense<0.000000e+00> : vector<4x8x8xf32>
      %44 = tpu.matmul %42, %43, %cst_41 {dimension_numbers = #tpu.dot_dimension_numbers<[2], [1], [1], [2], [0, 0, 0, 1, 1, 2], [0], [0]>} : vector<4x8x32xf32>, vector<4x32x8xf32>, vector<4x8x8xf32> -> vector<4x8x8xf32>
      "tpu.trace_stop"() : () -> ()
      %c0_42 = arith.constant 0 : index
      %c0_43 = arith.constant 0 : index
      %c0_44 = arith.constant 0 : index
      %45 = vector.load %arg6[%c0_42, %c0_43, %c0_44] : memref<4x1x8xf32, #tpu.memory_space<vmem>>, vector<4x1x8xf32>
      %46 = vector.broadcast %45 : vector<4x1x8xf32> to vector<4x8x8xf32>
      %47 = arith.addf %44, %46 : vector<4x8x8xf32>
      %c0_45 = arith.constant 0 : index
      %c0_46 = arith.constant 0 : index
      %c0_47 = arith.constant 0 : index
      %48 = vector.load %arg11[%c0_45, %c0_46, %c0_47] : memref<4x8x8xf32, #tpu.memory_space<vmem>>, vector<4x8x8xf32>
      tpu.vector_store %arg11[%c0_45, %c0_46, %c0_47], %47 {strides = array<i32>} : memref<4x8x8xf32, #tpu.memory_space<vmem>>, vector<4x8x8xf32>,
      %cst_48 = arith.constant 0xFF800000 : f32
      %49 = vector.broadcast %cst_48 : f32 to vector<4x8x1xf32>
      %c0_49 = arith.constant 0 : index
      %c0_50 = arith.constant 0 : index
      %c0_51 = arith.constant 0 : index
      %50 = vector.load %arg12[%c0_49, %c0_50, %c0_51] : memref<4x8x1xf32, #tpu.memory_space<vmem>>, vector<4x8x1xf32>
      tpu.vector_store %arg12[%c0_49, %c0_50, %c0_51], %49 {strides = array<i32>} : memref<4x8x1xf32, #tpu.memory_space<vmem>>, vector<4x8x1xf32>,
      %cst_52 = arith.constant 0.000000e+00 : f32
      %51 = vector.broadcast %cst_52 : f32 to vector<4x8x1xf32>
      %c0_53 = arith.constant 0 : index
      %c0_54 = arith.constant 0 : index
      %c0_55 = arith.constant 0 : index
      %52 = vector.load %arg13[%c0_53, %c0_54, %c0_55] : memref<4x8x1xf32, #tpu.memory_space<vmem>>, vector<4x8x1xf32>
      tpu.vector_store %arg13[%c0_53, %c0_54, %c0_55], %51 {strides = array<i32>} : memref<4x8x1xf32, #tpu.memory_space<vmem>>, vector<4x8x1xf32>,
      %cst_56 = arith.constant 0.000000e+00 : f32
      %53 = vector.broadcast %cst_56 : f32 to vector<4x8x8xf32>
      %c0_57 = arith.constant 0 : index
      %c0_58 = arith.constant 0 : index
      %c0_59 = arith.constant 0 : index
      %54 = vector.load %arg14[%c0_57, %c0_58, %c0_59] : memref<4x8x8xf32, #tpu.memory_space<vmem>>, vector<4x8x8xf32>
      tpu.vector_store %arg14[%c0_57, %c0_58, %c0_59], %53 {strides = array<i32>} : memref<4x8x8xf32, #tpu.memory_space<vmem>>, vector<4x8x8xf32>,
    } else {
    }
    %c0 = arith.constant 0 : index
    %c0_1 = arith.constant 0 : index
    %c0_2 = arith.constant 0 : index
    %3 = vector.load %arg4[%c0, %c0_1, %c0_2] : memref<1x8x32xf32, #tpu.memory_space<vmem>>, vector<1x8x32xf32>
    %4 = vector.shape_cast %3 : vector<1x8x32xf32> to vector<1x8x32xf32>
    %5 = vector.broadcast %4 : vector<1x8x32xf32> to vector<4x8x32xf32>
    %c0_3 = arith.constant 0 : index
    %c0_4 = arith.constant 0 : index
    %c0_5 = arith.constant 0 : index
    %6 = vector.load %arg7[%c0_3, %c0_4, %c0_5] : memref<4x32x16xf32, #tpu.memory_space<vmem>>, vector<4x32x16xf32>
    "tpu.trace_start"() <{level = 10 : i32, message = "hkd,hde->hke"}> : () -> ()
    %cst = arith.constant dense<0.000000e+00> : vector<4x8x16xf32>
    %7 = tpu.matmul %5, %6, %cst {dimension_numbers = #tpu.dot_dimension_numbers<[2], [1], [1], [2], [0, 0, 0, 1, 1, 2], [0], [0]>} : vector<4x8x32xf32>, vector<4x32x16xf32>, vector<4x8x16xf32> -> vector<4x8x16xf32>
    "tpu.trace_stop"() : () -> ()
    %c0_6 = arith.constant 0 : index
    %c0_7 = arith.constant 0 : index
    %c0_8 = arith.constant 0 : index
    %8 = vector.load %arg8[%c0_6, %c0_7, %c0_8] : memref<4x1x16xf32, #tpu.memory_space<vmem>>, vector<4x1x16xf32>
    %9 = vector.broadcast %8 : vector<4x1x16xf32> to vector<4x8x16xf32>
    %10 = arith.addf %7, %9 : vector<4x8x16xf32>
    %11 = vector.extract_strided_slice %10 {offsets = [0, 0, 0], sizes = [4, 8, 8], strides = [1, 1, 1]} : vector<4x8x16xf32> to vector<4x8x8xf32>
    %12 = vector.extract_strided_slice %10 {offsets = [0, 0, 8], sizes = [4, 8, 8], strides = [1, 1, 1]} : vector<4x8x16xf32> to vector<4x8x8xf32>
    %c0_9 = arith.constant 0 : index
    %c0_10 = arith.constant 0 : index
    %c0_11 = arith.constant 0 : index
    %13 = vector.load %arg11[%c0_9, %c0_10, %c0_11] : memref<4x8x8xf32, #tpu.memory_space<vmem>>, vector<4x8x8xf32>
    "tpu.trace_start"() <{level = 10 : i32, message = "hqc,hkc->hqk"}> : () -> ()
    %cst_12 = arith.constant dense<0.000000e+00> : vector<4x8x8xf32>
    %14 = tpu.matmul %13, %11, %cst_12 {dimension_numbers = #tpu.dot_dimension_numbers<[2], [2], [1], [1], [0, 0, 0, 1, 1, 1], [0], [0]>} : vector<4x8x8xf32>, vector<4x8x8xf32>, vector<4x8x8xf32> -> vector<4x8x8xf32>
    "tpu.trace_stop"() : () -> ()
    %c0_13 = arith.constant 0 : index
    %c0_14 = arith.constant 0 : index
    %c0_15 = arith.constant 0 : index
    %15 = vector.load %arg12[%c0_13, %c0_14, %c0_15] : memref<4x8x1xf32, #tpu.memory_space<vmem>>, vector<4x8x1xf32>
    %cst_16 = arith.constant dense<0xFF800000> : vector<4x8xf32>
    %16 = vector.multi_reduction <maximumf>, %14, %cst_16 [2] : vector<4x8x8xf32> to vector<4x8xf32>
    %17 = vector.shape_cast %16 : vector<4x8xf32> to vector<4x8x1xf32>
    %18 = arith.maximumf %15, %17 : vector<4x8x1xf32>
    %19 = arith.subf %15, %18 : vector<4x8x1xf32>
    %20 = math.exp %19 : vector<4x8x1xf32>
    %21 = vector.broadcast %18 : vector<4x8x1xf32> to vector<4x8x8xf32>
    %22 = arith.subf %14, %21 : vector<4x8x8xf32>
    %23 = math.exp %22 : vector<4x8x8xf32>
    %c0_17 = arith.constant 0 : index
    %c0_18 = arith.constant 0 : index
    %c0_19 = arith.constant 0 : index
    %24 = vector.load %arg13[%c0_17, %c0_18, %c0_19] : memref<4x8x1xf32, #tpu.memory_space<vmem>>, vector<4x8x1xf32>
    %25 = arith.mulf %20, %24 : vector<4x8x1xf32>
    %cst_20 = arith.constant dense<0.000000e+00> : vector<4x8xf32>
    %26 = vector.multi_reduction <add>, %23, %cst_20 [2] : vector<4x8x8xf32> to vector<4x8xf32>
    %27 = vector.shape_cast %26 : vector<4x8xf32> to vector<4x8x1xf32>
    %28 = arith.addf %25, %27 : vector<4x8x1xf32>
    %c0_21 = arith.constant 0 : index
    %c0_22 = arith.constant 0 : index
    %c0_23 = arith.constant 0 : index
    %29 = vector.load %arg13[%c0_21, %c0_22, %c0_23] : memref<4x8x1xf32, #tpu.memory_space<vmem>>, vector<4x8x1xf32>
    tpu.vector_store %arg13[%c0_21, %c0_22, %c0_23], %28 {strides = array<i32>} : memref<4x8x1xf32, #tpu.memory_space<vmem>>, vector<4x8x1xf32>,
    %c0_24 = arith.constant 0 : index
    %c0_25 = arith.constant 0 : index
    %c0_26 = arith.constant 0 : index
    %30 = vector.load %arg14[%c0_24, %c0_25, %c0_26] : memref<4x8x8xf32, #tpu.memory_space<vmem>>, vector<4x8x8xf32>
    %31 = vector.broadcast %20 : vector<4x8x1xf32> to vector<4x8x8xf32>
    %32 = arith.mulf %31, %30 : vector<4x8x8xf32>
    "tpu.trace_start"() <{level = 10 : i32, message = "hqk,hkd->hqd"}> : () -> ()
    %cst_27 = arith.constant dense<0.000000e+00> : vector<4x8x8xf32>
    %33 = tpu.matmul %23, %12, %cst_27 {dimension_numbers = #tpu.dot_dimension_numbers<[2], [1], [1], [2], [0, 0, 0, 1, 1, 2], [0], [0]>} : vector<4x8x8xf32>, vector<4x8x8xf32>, vector<4x8x8xf32> -> vector<4x8x8xf32>
    "tpu.trace_stop"() : () -> ()
    %34 = arith.addf %32, %33 : vector<4x8x8xf32>
    %c0_28 = arith.constant 0 : index
    %c0_29 = arith.constant 0 : index
    %c0_30 = arith.constant 0 : index
    %35 = vector.load %arg14[%c0_28, %c0_29, %c0_30] : memref<4x8x8xf32, #tpu.memory_space<vmem>>, vector<4x8x8xf32>
    tpu.vector_store %arg14[%c0_28, %c0_29, %c0_30], %34 {strides = array<i32>} : memref<4x8x8xf32, #tpu.memory_space<vmem>>, vector<4x8x8xf32>,
    %c0_31 = arith.constant 0 : index
    %c0_32 = arith.constant 0 : index
    %c0_33 = arith.constant 0 : index
    %36 = vector.load %arg12[%c0_31, %c0_32, %c0_33] : memref<4x8x1xf32, #tpu.memory_space<vmem>>, vector<4x8x1xf32>
    tpu.vector_store %arg12[%c0_31, %c0_32, %c0_33], %18 {strides = array<i32>} : memref<4x8x1xf32, #tpu.memory_space<vmem>>, vector<4x8x1xf32>,
    %c3_i32 = arith.constant 3 : i32
    %37 = arith.cmpi eq, %arg2, %c3_i32 : i32
    %38 = arith.extui %37 : i1 to i32
    %c0_i32_34 = arith.constant 0 : i32
    %39 = arith.cmpi ne, %38, %c0_i32_34 : i32
    scf.if %39 {
      %c0_35 = arith.constant 0 : index
      %c0_36 = arith.constant 0 : index
      %c0_37 = arith.constant 0 : index
      %40 = vector.load %arg13[%c0_35, %c0_36, %c0_37] : memref<4x8x1xf32, #tpu.memory_space<vmem>>, vector<4x8x1xf32>
      %41 = tpu.reciprocal %40 : vector<4x8x1xf32> -> vector<4x8x1xf32>
      %c0_38 = arith.constant 0 : index
      %c0_39 = arith.constant 0 : index
      %c0_40 = arith.constant 0 : index
      %42 = vector.load %arg14[%c0_38, %c0_39, %c0_40] : memref<4x8x8xf32, #tpu.memory_space<vmem>>, vector<4x8x8xf32>
      %43 = vector.broadcast %41 : vector<4x8x1xf32> to vector<4x8x8xf32>
      %44 = arith.mulf %42, %43 : vector<4x8x8xf32>
      %c0_41 = arith.constant 0 : index
      %c0_42 = arith.constant 0 : index
      %c0_43 = arith.constant 0 : index
      %45 = vector.load %arg9[%c0_41, %c0_42, %c0_43] : memref<4x8x32xf32, #tpu.memory_space<vmem>>, vector<4x8x32xf32>
      "tpu.trace_start"() <{level = 10 : i32, message = "hqd,hdm->hqm"}> : () -> ()
      %cst_44 = arith.constant dense<0.000000e+00> : vector<4x8x32xf32>
      %46 = tpu.matmul %44, %45, %cst_44 {dimension_numbers = #tpu.dot_dimension_numbers<[2], [1], [1], [2], [0, 0, 0, 1, 1, 2], [0], [0]>} : vector<4x8x8xf32>, vector<4x8x32xf32>, vector<4x8x32xf32> -> vector<4x8x32xf32>
      "tpu.trace_stop"() : () -> ()
      %cst_45 = arith.constant dense<0.000000e+00> : vector<8x32xf32>
      %47 = vector.multi_reduction <add>, %46, %cst_45 [0] : vector<4x8x32xf32> to vector<8x32xf32>
      %c0_46 = arith.constant 0 : index
      %c0_47 = arith.constant 0 : index
      %c0_48 = arith.constant 0 : index
      %48 = vector.load %arg10[%c0_46, %c0_47, %c0_48] : memref<1x8x32xf32, #tpu.memory_space<vmem>>, vector<1x8x32xf32>
      %49 = vector.shape_cast %48 : vector<1x8x32xf32> to vector<8x32xf32>
      %50 = vector.shape_cast %47 : vector<8x32xf32> to vector<1x8x32xf32>
      tpu.vector_store %arg10[%c0_46, %c0_47, %c0_48], %50 {strides = array<i32>} : memref<1x8x32xf32, #tpu.memory_space<vmem>>, vector<1x8x32xf32>,
    } else {
    }
    return
  }
  func.func @transform_0(%arg0: i32, %arg1: i32, %arg2: i32) -> (i32, i32, i32) {
    %c0_i32 = arith.constant 0 : i32
    %c0_i32_0 = arith.constant 0 : i32
    return %arg0, %arg1, %c0_i32 : i32, i32, i32
  }
  func.func @transform_1(%arg0: i32, %arg1: i32, %arg2: i32) -> (i32, i32, i32) {
    %c0_i32 = arith.constant 0 : i32
    %c0_i32_0 = arith.constant 0 : i32
    return %arg0, %arg2, %c0_i32 : i32, i32, i32
  }
  func.func @transform_2(%arg0: i32, %arg1: i32, %arg2: i32) -> (i32, i32, i32) {
    %c0_i32 = arith.constant 0 : i32
    %c0_i32_0 = arith.constant 0 : i32
    %c0_i32_1 = arith.constant 0 : i32
    %c0_i32_2 = arith.constant 0 : i32
    return %c0_i32, %c0_i32_0, %c0_i32_1 : i32, i32, i32
  }
  func.func @transform_3(%arg0: i32, %arg1: i32, %arg2: i32) -> (i32, i32, i32) {
    %c0_i32 = arith.constant 0 : i32
    %c0_i32_0 = arith.constant 0 : i32
    %c0_i32_1 = arith.constant 0 : i32
    %c0_i32_2 = arith.constant 0 : i32
    return %c0_i32, %c0_i32_0, %c0_i32_1 : i32, i32, i32
  }
  func.func @transform_4(%arg0: i32, %arg1: i32, %arg2: i32) -> (i32, i32, i32) {
    %c0_i32 = arith.constant 0 : i32
    %c0_i32_0 = arith.constant 0 : i32
    %c0_i32_1 = arith.constant 0 : i32
    %c0_i32_2 = arith.constant 0 : i32
    return %c0_i32, %c0_i32_0, %c0_i32_1 : i32, i32, i32
  }
  func.func @transform_5(%arg0: i32, %arg1: i32, %arg2: i32) -> (i32, i32, i32) {
    %c0_i32 = arith.constant 0 : i32
    %c0_i32_0 = arith.constant 0 : i32
    %c0_i32_1 = arith.constant 0 : i32
    %c0_i32_2 = arith.constant 0 : i32
    return %c0_i32, %c0_i32_0, %c0_i32_1 : i32, i32, i32
  }
  func.func @transform_6(%arg0: i32, %arg1: i32, %arg2: i32) -> (i32, i32, i32) {
    %c0_i32 = arith.constant 0 : i32
    %c0_i32_0 = arith.constant 0 : i32
    %c0_i32_1 = arith.constant 0 : i32
    %c0_i32_2 = arith.constant 0 : i32
    return %c0_i32, %c0_i32_0, %c0_i32_1 : i32, i32, i32
  }
  func.func @transform_7(%arg0: i32, %arg1: i32, %arg2: i32) -> (i32, i32, i32) {
    %c0_i32 = arith.constant 0 : i32
    %c0_i32_0 = arith.constant 0 : i32
    return %arg0, %arg1, %c0_i32 : i32, i32, i32
  }
}

</mosaic_0001>

<bundles_post_ra>
// kernel: tpu_custom_call.1
= control target key start
LH: loop header
LB: loop body
LE: loop exit
PB: predicated region body
PF: predicated region fallthrough
CT: control target
= control target key end

     0   :  { %s3962_s0 = inlined_call_operand.hbm [shape: f32[2,32,32], index: 0, kind: input, shape index: {}]   ;;  %s3963_s1 = inlined_call_operand.hbm [shape: f32[2,32,32], index: 1, kind: input, shape index: {}]   ;;  %s3964_s2 = inlined_call_operand.hbm [shape: f32[4,32,8], index: 2, kind: input, shape index: {}]   ;;  %s3965_s3 = inlined_call_operand.hbm [shape: f32[4,1,8], index: 3, kind: input, shape index: {}]   ;;  %s3966_s4 = inlined_call_operand.hbm [shape: f32[4,32,16], index: 4, kind: input, shape index: {}]   ;;  %s3967_s5 = inlined_call_operand.hbm [shape: f32[4,1,16], index: 5, kind: input, shape index: {}]   ;;  %s3968_s6 = inlined_call_operand.hbm [shape: f32[4,8,32], index: 6, kind: input, shape index: {}]   ;;  %s3969_s7 = inlined_call_operand.hbm [shape: f32[2,32,32], index: 7, kind: output, shape index: {}]  }
   0x1   :  { %3987 = sst [smem:[#allocation34_spill]] %s3963_s1 }
   0x2   :  { %3988 = sst [smem:[#allocation35_spill]] %s3964_s2 }
   0x3   :  { %3989 = sst [smem:[#allocation36_spill]] %s3965_s3 }
   0x4   :  { %3990 = sst [smem:[#allocation37_spill]] %s3966_s4 }
   0x5   :  { %3991 = sst [smem:[#allocation38_spill]] %s3967_s5 }
   0x6   :  { %3992 = sst [smem:[#allocation39_spill]] %s3968_s6 }
   0x7   :  { %3993 = sst [smem:[#allocation40_spill]] %s3969_s7 }
   0x8   :  { %12 = vsyncpa [#allocation7], 0 }
   0x9   :  { %14 = vsyncpa [#allocation7 + $0x1], 0 }
   0xa   :  { %15 = vsyncpa [#allocation10], 0 }
   0xb   :  { %17 = vsyncpa [#allocation10 + $0x1], 0 }
   0xc   :  { %18 = vsyncpa [#allocation13], 0 }
   0xd   :  { %19 = vsyncpa [#allocation16], 0 }
   0xe   :  { %20 = vsyncpa [#allocation8], 0 }
   0xf   :  { %22 = vsyncpa [#allocation8 + $0x1], 0  ;;  %s3342_s24 = smov 0   ;;  %s3344_s25 = smov 0  }
  0x10   :  { %s3346_s26 = smov 0   ;;  %s3348_s27 = smov 0  }
  0x11   :  { %s3350_s28 = smov 0   ;;  %s3352_s29 = smov 0  }
  0x12   :  { %s3354_s30 = smov 0   ;;  %s3356_s8 = smov 0  }
  0x13   :  { %s3358_s9 = smov 0   ;;  %s3360_s10 = smov 0  }
  0x14   :  { %s3362_s11 = smov 0   ;;  %s3364_s12 = smov 0  }
  0x15   :  { %s3366_s13 = smov 0  }
  0x16 LB: > { %3994 = sst [smem:[#allocation25_spill]] %s3228_s24  ;;  %s3408_s14 = sadd.s32 4294967295, %s3276_s13   ;;  %s3276_s13 = sphi %s3366_s13, %s28_s13   ;;  %s3272_s12 = sphi %s3364_s12, %s4061_s12   ;;  %s3268_s11 = sphi %s3362_s11, %s4060_s11   ;;  %s3264_s10 = sphi %s3360_s10, %s4059_s10   ;;  %s3260_s9 = sphi %s3358_s9, %s4058_s9   ;;  %s3256_s8 = sphi %s3356_s8, %s4057_s8   ;;  %s3252_s30 = sphi %s3354_s30, %s4056_s30   ;;  %s3248_s29 = sphi %s3352_s29, %s4055_s29   ;;  %s3244_s28 = sphi %s3350_s28, %s4054_s28   ;;  %s3240_s27 = sphi %s3348_s27, %s4053_s27   ;;  %s3236_s26 = sphi %s3346_s26, %s4052_s26   ;;  %s3232_s25 = sphi %s3344_s25, %s4051_s25   ;;  %s3228_s24 = sphi %s3342_s24, %s4050_s24  }
  0x17   : > { %3995 = sst [smem:[#allocation26_spill]] %s3240_s27  ;;  %p2383_p0 = scmp.ge.s32.totalorder %s3276_s13, 1 }
  0x18   : > { %3996 = sst [smem:[#allocation27_spill]] %s3252_s30  ;;  %p3971_p1 = scmp.eq.s32.totalorder %s3408_s14, 0 }
  0x19   : > { %3997 = sst [smem:[#allocation28_spill]] %s3256_s8  ;;  %p241_p2 = scmp.lt.s32.totalorder %s3276_s13, 33 }
  0x1a   : > { %3998 = sst [smem:[#allocation29_spill]] %s3260_s9  ;;  %s3278_s16 = smov [#allocation11]  }
  0x1b   : > { %p3413_p3 = pnand %p2383_p0, %p241_p2  ;;  %s253_s17 = sshll.u32 %s3278_s16, 4  ;;  %s254_s17 = int_to_ptr.vmem [resolvable:$true] %s253_s17 }
  0x1c   : > { %s3279_s19 = smov [#allocation12]   ;;  %s4002_s2 = sld [smem:[#allocation35_spill]] }
  0x1d   : > { %s3999_s15 = scalar_select %p3413_p3, 1, 0 }
  0x1e   : > { %p2730_p4 = pneg %p3413_p3  ;;  %s266_s20 = sshll.u32 %s3279_s19, 4  ;;  %s3425_s20 = int_to_ptr.vmem [resolvable:$true] %s266_s20 }
  0x1f   : > { %4000 = sst [smem:[#allocation30_spill]] %s3999_s15 }
  0x20   : > { %p3421_p5 = pnand %p2730_p4, %p3971_p1 }
  0x22   : > { %s2922_s23 = scalar_lea.hbm %s4002_s2, 2048  ;;  %p3435_p7 = pneg %p3421_p5 }
  0x23   : > { %p2923_p6 = scmp.ne.s32.totalorder %s4002_s2, %s2922_s23  ;;  %p2929_p10 = scmp.lt.u32.totalorder %s2922_s23, %s4002_s2 }
  0x25   : > { %p2925_p8 = pnand %p3435_p7, %p2923_p6 }
  0x27   : > { %p2926_p9 = pneg %p2925_p8 }
  0x29   : > { %p2931_p11 = pnand %p2929_p10, %p2926_p9 }
  0x2b   : > { %2934 = shalt.err (!%p2931_p11)
}
  0x2c   : > { %s2935_s21 = scalar_lea.vmem %s254_s17, 2048  ;;  %p2943_p2 = scmp.lt.s32.totalorder %s254_s17, %s254_s17 }
  0x2d   : > { %p2936_p12 = scmp.ne.s32.totalorder %s254_s17, %s2935_s21  ;;  %p2944_p4 = scmp.lt.s32.totalorder %s2935_s21, %s2935_s21 }
  0x2f   : > { %p2938_p13 = pnand %p2936_p12, %p3435_p7  ;;  %p2945_p1 = por %p2944_p4, %p2943_p2 }
  0x31   : > { %p2939_p0 = pneg %p2938_p13 }
  0x33   : > { %p2946_p3 = pnand %p2945_p1, %p2939_p0 }
  0x35   : > { %2949 = shalt.err (!%p2946_p3)
}
  0x36   : > { %s3975_s7 = smov 128   ;;  %s3977_s8 = smov 8  }
  0x37   : > { %2733 = dma.hbm_to_vmem [thread:$0]  (!%p3421_p5), %s4002_s2, 2048, %s254_s17, [#allocation10], %s3975_s7, %s3975_s7, %s3977_s8  }
  0x38   : > { %s4004_s3 = sld [smem:[#allocation36_spill]] }
  0x3e   : > { %s2950_s30 = scalar_lea.hbm %s4004_s3, 64 }
  0x3f   : > { %p2951_p1 = scmp.ne.s32.totalorder %s4004_s3, %s2950_s30  ;;  %p2957_p8 = scmp.lt.u32.totalorder %s2950_s30, %s4004_s3 }
  0x41   : > { %p2953_p3 = pnand %p2951_p1, %p3435_p7 }
  0x43   : > { %p2954_p6 = pneg %p2953_p3 }
  0x45   : > { %p2959_p9 = pnand %p2957_p8, %p2954_p6 }
  0x47   : > { %2962 = shalt.err (!%p2959_p9)
}
  0x48   : > { %s2963_s17 = scalar_lea.vmem %s3425_s20, 64  ;;  %p2971_p13 = scmp.lt.s32.totalorder %s3425_s20, %s3425_s20 }
  0x49   : > { %p2964_p10 = scmp.ne.s32.totalorder %s3425_s20, %s2963_s17  ;;  %p2972_p0 = scmp.lt.s32.totalorder %s2963_s17, %s2963_s17 }
  0x4b   : > { %p2966_p11 = pnand %p2964_p10, %p3435_p7  ;;  %p2973_p2 = por %p2972_p0, %p2971_p13 }
  0x4d   : > { %p2967_p12 = pneg %p2966_p11 }
  0x4f   : > { %p2974_p4 = pnand %p2973_p2, %p2967_p12 }
  0x51   : > { %2977 = shalt.err (!%p2974_p4)
}
  0x52   : > { %s3282_s15 = smov 16   ;;  %s3283_s1 = smov 1  }
  0x53   : > { %2736 = dma.hbm_to_vmem [thread:$0]  (!%p3421_p5), %s4004_s3, 64, %s3425_s20, [#allocation13], %s3282_s15, %s3282_s15, %s3283_s1  }
  0x54   : > { %s3284_s9 = smov [#allocation15]   ;;  %s3285_s23 = smov [#allocation14]  }
  0x55   : > { %s292_s22 = sshll.u32 %s3284_s9, 4  ;;  %s279_s19 = sshll.u32 %s3285_s23, 4  ;;  %s293_s22 = int_to_ptr.vmem [resolvable:$true] %s292_s22  ;;  %s3477_s19 = int_to_ptr.vmem [resolvable:$true] %s279_s19 }
  0x56   : > { %s4005_s5 = sld [smem:[#allocation38_spill]] }
  0x5c   : > { %s2978_s7 = scalar_lea.hbm %s4005_s5, 64 }
  0x5d   : > { %p2979_p1 = scmp.ne.s32.totalorder %s4005_s5, %s2978_s7  ;;  %p2985_p8 = scmp.lt.u32.totalorder %s2978_s7, %s4005_s5 }
  0x5f   : > { %p2981_p3 = pnand %p2979_p1, %p3435_p7 }
  0x61   : > { %p2982_p6 = pneg %p2981_p3 }
  0x63   : > { %p2987_p9 = pnand %p2985_p8, %p2982_p6 }
  0x65   : > { %2990 = shalt.err (!%p2987_p9)
}
  0x66   : > { %s2991_s30 = scalar_lea.vmem %s293_s22, 64  ;;  %p2999_p13 = scmp.lt.s32.totalorder %s293_s22, %s293_s22 }
  0x67   : > { %p2992_p10 = scmp.ne.s32.totalorder %s293_s22, %s2991_s30  ;;  %p3000_p0 = scmp.lt.s32.totalorder %s2991_s30, %s2991_s30 }
  0x69   : > { %p2994_p11 = pnand %p2992_p10, %p3435_p7  ;;  %p3001_p2 = por %p3000_p0, %p2999_p13 }
  0x6b   : > { %p2995_p12 = pneg %p2994_p11 }
  0x6d   : > { %p3002_p4 = pnand %p3001_p2, %p2995_p12 }
  0x6f   : > { %3005 = shalt.err (!%p3002_p4)
}
  0x70   : > { %2742 = dma.hbm_to_vmem [thread:$0]  (!%p3421_p5), %s4005_s5, 64, %s293_s22, [#allocation16], %s3282_s15, %s3282_s15, %s3283_s1  }
  0x71   : > { %s4006_s4 = sld [smem:[#allocation37_spill]] }
  0x77   : > { %s3006_s23 = scalar_lea.hbm %s4006_s4, 2048 }
  0x78   : > { %p3007_p1 = scmp.ne.s32.totalorder %s4006_s4, %s3006_s23  ;;  %p3013_p8 = scmp.lt.u32.totalorder %s3006_s23, %s4006_s4 }
  0x7a   : > { %p3009_p3 = pnand %p3007_p1, %p3435_p7 }
  0x7c   : > { %p3010_p6 = pneg %p3009_p3 }
  0x7e   : > { %p3015_p9 = pnand %p3013_p8, %p3010_p6 }
  0x80   : > { %3018 = shalt.err (!%p3015_p9)
}
  0x81   : > { %s3019_s15 = scalar_lea.vmem %s3477_s19, 2048  ;;  %p3027_p13 = scmp.lt.s32.totalorder %s3477_s19, %s3477_s19 }
  0x82   : > { %p3020_p10 = scmp.ne.s32.totalorder %s3477_s19, %s3019_s15  ;;  %p3028_p0 = scmp.lt.s32.totalorder %s3019_s15, %s3019_s15 }
  0x84   : > { %p3022_p11 = pnand %p3020_p10, %p3435_p7  ;;  %p3029_p2 = por %p3028_p0, %p3027_p13 }
  0x86   : > { %p3023_p12 = pneg %p3022_p11 }
  0x88   : > { %p3030_p4 = pnand %p3029_p2, %p3023_p12 }
  0x8a   : > { %3033 = shalt.err (!%p3030_p4)
}
  0x8b   : > { %s4007_s1 = smov 8   ;;  %s4008_s22 = smov 128  }
  0x8c   : > { %2739 = dma.hbm_to_vmem [thread:$0]  (!%p3421_p5), %s4006_s4, 2048, %s3477_s19, [#allocation13], %s4008_s22, %s4008_s22, %s4007_s1  }
  0x8d   : > { %s3286_s8 = smov [#allocation17]   ;;  %s4009_s6 = sld [smem:[#allocation39_spill]] }
  0x8e   : > { %s305_s7 = sshll.u32 %s3286_s8, 4  ;;  %s306_s7 = int_to_ptr.vmem [resolvable:$true] %s305_s7 }
  0x93   : > { %s3034_s21 = scalar_lea.hbm %s4009_s6, 512 }
  0x94   : > { %p3035_p1 = scmp.ne.s32.totalorder %s4009_s6, %s3034_s21  ;;  %p3041_p8 = scmp.lt.u32.totalorder %s3034_s21, %s4009_s6 }
  0x96   : > { %p3037_p3 = pnand %p3035_p1, %p3435_p7 }
  0x98   : > { %p3038_p6 = pneg %p3037_p3 }
  0x9a   : > { %p3043_p9 = pnand %p3041_p8, %p3038_p6 }
  0x9c   : > { %3046 = shalt.err (!%p3043_p9)
}
  0x9d   : > { %s3047_s19 = scalar_lea.vmem %s306_s7, 512  ;;  %p3055_p13 = scmp.lt.s32.totalorder %s306_s7, %s306_s7 }
  0x9e   : > { %p3048_p10 = scmp.ne.s32.totalorder %s306_s7, %s3047_s19  ;;  %p3056_p0 = scmp.lt.s32.totalorder %s3047_s19, %s3047_s19 }
  0xa0   : > { %p3050_p11 = pnand %p3048_p10, %p3435_p7  ;;  %p3057_p2 = por %p3056_p0, %p3055_p13 }
  0xa2   : > { %p3051_p12 = pneg %p3050_p11 }
  0xa4   : > { %p3058_p4 = pnand %p3057_p2, %p3051_p12 }
  0xa6   : > { %3061 = shalt.err (!%p3058_p4)
}
  0xa7   : > { %2745 = dma.hbm_to_vmem [thread:$0]  (!%p3421_p5), %s4009_s6, 512, %s306_s7, [#allocation16], %s4008_s22, %s4008_s22, %s4007_s1  }
  0xa8   : > { %s2382_s18 = sadd.s32 4294967294, %s3276_s13   ;;  %s40_s16 = sadd.s32 1, %s3264_s10 }
  0xa9   : > { %s43_s8 = sadd.s32 1, %s3268_s11  ;;  %p41_p7 = scmp.ge.s32.totalorder %s40_s16, 4 }
  0xaa   : > { %s47_s9 = sadd.s32 1, %s3272_s12  ;;  %s56_s23 = sadd.s32 1, %s3248_s29 }
  0xab   : > { %p63_p1 = scmp.ne.s32.totalorder %s3248_s29, %s3244_s28  ;;  %s4063_s16 = smov (%p41_p7, %s40_s16), 0 }
  0xac   : > { %4010 = sst [smem:[#allocation31_spill]] %s4063_s16  ;;  %s4065_s8 = smov (!%p41_p7, %s43_s8), %s3268_s11 }
  0xad   : > { %p3984_p5 = scmp.eq.s32.totalorder %s3276_s13, 0  ;;  %p69_p3 = scmp.ne.s32.totalorder %s3244_s28, %s3240_s27 }
  0xae   : > { %p45_p6 = scmp.ge.s32.totalorder %s4065_s8, 4  ;;  %s80_s1 = ssub.s32 %s3264_s10, %s4063_s16 }
  0xaf   : > { %p3564_p8 = por %p3984_p5, %p63_p1  ;;  %p4012_p9 = scmp.eq.s32.totalorder %s3408_s14, 0 }
  0xb0   : > { %s4067_s8 = smov (%p45_p6, %s4065_s8), 0  ;;  %s4069_s9 = smov (!%p45_p6, %s47_s9), %s3272_s12 }
  0xb1   : > { %p3573_p10 = por %p4012_p9, %p69_p3  ;;  %4014 = sst [smem:[#allocation32_spill]] %s4067_s8 }
  0xb2   : > { %s52_s21 = ssub.s32 %s3268_s11, %s4067_s8  ;;  %p228_p11 = scmp.eq.s32.totalorder %s3408_s14, 31 }
  0xb3   : > { %p49_p12 = scmp.ge.s32.totalorder %s4069_s9, 2  ;;  %p234_p13 = scmp.eq.s32.totalorder %s2382_s18, 31 }
  0xb4   : > { %p3586_p0 = por %p228_p11, %p63_p1  ;;  %p3983_p2 = scmp.lt.s32.totalorder %s3276_s13, 32 }
  0xb5   : > { %s4071_s9 = smov (%p49_p12, %s4069_s9), 0  ;;  %p3596_p4 = por %p234_p13, %p69_p3 }
  0xb6   : > { %s4015_s17 = scalar_select %p3586_p0, 1, 0 }
  0xb7   : > { %s4016_s24 = scalar_select %p3596_p4, 1, 0 }
  0xb8   : > { %s319_s20 = sand.u32 1, %s3248_s29   ;;  %s51_s15 = ssub.s32 %s3272_s12, %s4071_s9 }
  0xb9   : > { %4017 = sst [smem:[#allocation33_spill]] %s4016_s24  ;;  %s53_s19 = sor.u32 %s52_s21, %s51_s15 }
  0xba   : > { %s3603_s30 = sor.u32 %s80_s1, %s51_s15  ;;  %p54_p7 = scmp.eq.s32.totalorder %s53_s19, 0 }
  0xbb   : > { %s2390_s2 = sshll.u32 %s319_s20, 3  ;;  %s2391_s18 = sshll.u32 %s3272_s12, 2 }
  0xbc   : > { %s3608_s3 = scalar_select %p54_p7, %s3248_s29, %s56_s23  }
  0xbd   : > { %s328_s4 = sadd.s32 %s3268_s11, %s2391_s18  ;;  %s323_s6 = scalar_lea.vmem [#allocation6], %s2390_s2 }
  0xbe   : > { %s2392_s5 = sshll.u32 %s328_s4, 7  ;;  %s332_s8 = sshll.u32 %s323_s6, 4  ;;  %s3616_s8 = int_to_ptr.vmem [resolvable:$true] %s332_s8 }
  0xbf   : > { %s3614_s27 = scalar_lea.hbm %s3962_s0, %s2392_s5  ;;  %p3622_p3 = pnand %p3983_p2, %p3564_p8 }
  0xc0   : > { %s3627_s4 = sadd.s32 %s3264_s10, %s2391_s18  ;;  %s320_s6 = scalar_lea.sflag [#allocation7], %s319_s20 }
  0xc1   : > { %s3062_s16 = scalar_lea.hbm %s3614_s27, 128  ;;  %p3064_p9 = pneg %p3622_p3 }
  0xc2   : > { %p3063_p6 = scmp.ne.s32.totalorder %s3614_s27, %s3062_s16  ;;  %s3067_s22 = scalar_lea.hbm %s3962_s0, 1024 }
  0xc3   : > { %p3068_p8 = scmp.lt.u32.totalorder %s3614_s27, %s3962_s0  ;;  %p3069_p13 = scmp.lt.u32.totalorder %s3067_s22, %s3062_s16 }
  0xc4   : > { %p3065_p11 = pnand %p3064_p9, %p3063_p6  ;;  %p3071_p2 = scmp.lt.u32.totalorder %s3062_s16, %s3614_s27 }
  0xc5   : > { %p3070_p7 = por %p3069_p13, %p3068_p8 }
  0xc6   : > { %p3066_p12 = pneg %p3065_p11 }
  0xc7   : > { %p3072_p5 = por %p3071_p2, %p3070_p7 }
  0xc9   : > { %p3073_p1 = pnand %p3072_p5, %p3066_p12 }
  0xcb   : > { %3076 = shalt.err (!%p3073_p1)
}
  0xcc   : > { %s3077_s20 = scalar_lea.vmem %s3616_s8, 128  ;;  %s3287_s15 = smov [#allocation6]  }
  0xcd   : > { %p3078_p6 = scmp.ne.s32.totalorder %s3616_s8, %s3077_s20  ;;  %s3082_s19 = sshll.u32 %s3287_s15, 4  ;;  %s3083_s19 = int_to_ptr.vmem [resolvable:$false] %s3082_s19 }
  0xce   : > { %s3084_s2 = scalar_lea.vmem %s3083_s19, 256  ;;  %p3085_p0 = scmp.lt.s32.totalorder %s3616_s8, %s3083_s19 }
  0xcf   : > { %p3080_p11 = pnand %p3078_p6, %p3064_p9  ;;  %p3086_p8 = scmp.lt.s32.totalorder %s3084_s2, %s3077_s20 }
  0xd1   : > { %p3081_p4 = pneg %p3080_p11  ;;  %p3087_p13 = por %p3086_p8, %p3085_p0 }
  0xd3   : > { %p3088_p2 = pnand %p3087_p13, %p3081_p4 }
  0xd5   : > { %3091 = shalt.err (!%p3088_p2)
}
  0xd6   : > { %s4019_s18 = sld [smem:[#allocation25_spill]]  ;;  %s84_s16 = sadd.s32 1, %s3236_s26 }
  0xd7   : > { %2749 = dma.hbm_to_vmem [thread:$0]  (!%p3622_p3), %s3614_s27, 128, %s3616_s8, %s320_s6  }
  0xd8   : > { %p4020_p5 = scmp.eq.s32.totalorder %s3603_s30, 0  ;;  %p91_p0 = scmp.ne.s32.totalorder %s3236_s26, %s3232_s25 }
  0xd9   : > { %s339_s23 = sand.u32 1, %s3276_s13   ;;  %s341_s1 = sand.u32 1, %s3236_s26  }
  0xda   : > { %s3658_s5 = scalar_select %p4020_p5, %s3236_s26, %s84_s16  }
  0xdb   : > { %p4021_p1 = scmp.eq.s32.totalorder %s3276_s13, 0  ;;  %p4022_p12 = scmp.eq.s32.totalorder %s3408_s14, 0 }
  0xdc   : > { %p97_p4 = scmp.ne.s32.totalorder %s3232_s25, %s4019_s18  ;;  %s2393_s21 = sshll.u32 %s341_s1, 3 }
  0xdd   : > { %p93_p9 = por %p91_p0, %p4021_p1  ;;  %s2395_s24 = sshll.u32 %s3627_s4, 7 }
  0xde   : > { %p3670_p7 = por %p97_p4, %p4022_p12  ;;  %s4024_s27 = sld [smem:[#allocation34_spill]] }
  0xdf   : > { %s343_s30 = scalar_lea.vmem [#allocation9], %s2393_s21  ;;  %p4026_p3 = scmp.lt.s32.totalorder %s3276_s13, 32 }
  0xe0   : > { %s4023_s22 = scalar_select %p3670_p7, 1, 0 }
  0xe1   : > { %s352_s19 = sshll.u32 %s343_s30, 4  ;;  %p3684_p6 = pnand %p4026_p3, %p93_p9  ;;  %s3680_s19 = int_to_ptr.vmem [resolvable:$true] %s352_s19 }
  0xe2   : > { %s340_s4 = scalar_lea.sflag [#allocation10], %s339_s23 }
  0xe3   : > { %p3094_p8 = pneg %p3684_p6 }
  0xe4   : > { %s4025_s6 = smov %s4024_s27  ;;  %s3678_s8 = scalar_lea.hbm %s4024_s27, %s2395_s24 }
  0xe5   : > { %s3092_s18 = scalar_lea.hbm %s3678_s8, 128  ;;  %s3097_s21 = scalar_lea.hbm %s4025_s6, 1024 }
  0xe6   : > { %p3093_p11 = scmp.ne.s32.totalorder %s3678_s8, %s3092_s18  ;;  %p3098_p5 = scmp.lt.u32.totalorder %s3678_s8, %s4025_s6 }
  0xe7   : > { %p3099_p0 = scmp.lt.u32.totalorder %s3097_s21, %s3092_s18  ;;  %p3101_p1 = scmp.lt.u32.totalorder %s3092_s18, %s3678_s8 }
  0xe8   : > { %p3095_p13 = pnand %p3094_p8, %p3093_p11 }
  0xe9   : > { %p3100_p4 = por %p3099_p0, %p3098_p5 }
  0xea   : > { %p3096_p2 = pneg %p3095_p13 }
  0xeb   : > { %p3102_p9 = por %p3101_p1, %p3100_p4 }
  0xed   : > { %p3103_p12 = pnand %p3102_p9, %p3096_p2 }
  0xef   : > { %3106 = shalt.err (!%p3103_p12)
}
  0xf0   : > { %s3107_s23 = scalar_lea.vmem %s3680_s19, 128  ;;  %s3288_s15 = smov [#allocation9]  }
  0xf1   : > { %p3108_p3 = scmp.ne.s32.totalorder %s3680_s19, %s3107_s23  ;;  %s3112_s27 = sshll.u32 %s3288_s15, 4  ;;  %s3113_s27 = int_to_ptr.vmem [resolvable:$false] %s3112_s27 }
  0xf2   : > { %s3114_s30 = scalar_lea.vmem %s3113_s27, 256  ;;  %p3115_p7 = scmp.lt.s32.totalorder %s3680_s19, %s3113_s27 }
  0xf3   : > { %p3110_p11 = pnand %p3108_p3, %p3094_p8  ;;  %p3116_p5 = scmp.lt.s32.totalorder %s3114_s30, %s3107_s23 }
  0xf5   : > { %p3111_p13 = pneg %p3110_p11  ;;  %p3117_p0 = por %p3116_p5, %p3115_p7 }
  0xf7   : > { %p3118_p4 = pnand %p3117_p0, %p3111_p13 }
  0xf9   : > { %3121 = shalt.err (!%p3118_p4)
}
  0xfa   : > { %2752 = dma.hbm_to_vmem [thread:$0]  (!%p3684_p6), %s3678_s8, 128, %s3680_s19, %s340_s4  }
  0xfb   : > { %s4028_s18 = sld [smem:[#allocation30_spill]] }
 0x101   : > { %p4029_p2 = scmp.ne.s32.totalorder %s4028_s18, 0 }
 0x102   : > { %s3716_s16 = sand.u32 (!%p4029_p2), 1, %s3244_s28  }
 0x103   : > { %361 = sbr.rel (%p4029_p2) target bundleno = 1805 (0x70d), region = 48  ;;  %s2397_s1 = sshll.u32 (!%p4029_p2), %s3716_s16, 3 }
 0x104   : > { %s364_s21 = scalar_lea.sflag (!%p4029_p2), [#allocation7], %s3716_s16  ;;  %s3720_s24 = scalar_lea.vmem (!%p4029_p2), [#allocation6], %s2397_s1 }
 0x10a   : > { %3203 = dma.done.wait (%p3573_p10), %s364_s21, 128  }
 0x10b   : > { %3205 = vsyncadd (%p3573_p10), %s364_s21, 4294967168  ;;  %s372_s8 = sand.u32 1, %s3408_s14   ;;  %s374_s19 = sand.u32 1, %s3232_s25  }
 0x10c   : > { %s3728_s2 = sshll.u32 %s374_s19, 3  ;;  %s373_s4 = scalar_lea.sflag [#allocation10], %s372_s8 }
 0x10d   : > { %s376_s20 = scalar_lea.vmem [#allocation9], %s3728_s2  ;;  %p4030_p7 = scmp.ne.s32.totalorder %s4023_s22, 0 }
 0x10f   : > { %3207 = dma.done.wait (%p4030_p7), %s373_s4, 128  }
 0x110   : > { %3209 = vsyncadd (%p4030_p7), %s373_s4, 4294967168  ;;  %p4031_p6 = scmp.eq.s32.totalorder %s3408_s14, 0 }
 0x112   : > { %3211 = dma.done.wait (%p4031_p6), [#allocation10], 2048   ;;  %p4032_p10 = pmov %p4031_p6 }
 0x113   : > { %p4033_p8 = pmov %p4031_p6 }
 0x114   : > { %3213 = vsyncadd (%p4032_p10), [#allocation10], 4294965248 }
 0x115   : > { %3215 = dma.done.wait (%p4033_p8), [#allocation13], 2112   ;;  %p4034_p1 = pmov %p4031_p6 }
 0x117   : > { %3217 = vsyncadd (%p4034_p1), [#allocation13], 4294965184  ;;  %p4035_p9 = pmov %p4034_p1 }
 0x118   : > { %p4036_p12 = pmov %p4034_p1 }
 0x119   : > { %3219 = dma.done.wait (%p4035_p9), [#allocation16], 576  }
 0x11a   : > { %3221 = vsyncadd (%p4036_p12), [#allocation16], 4294966720  ;;  %s3747_s7 = scalar_lea.vmem [#allocation18], %s2397_s1  ;;  %s4037_s22 = sld [smem:[#allocation27_spill]] }
 0x120   : > { %p2405_p3 = scmp.ne.s32.totalorder %s4037_s22, 0 }
 0x121   : > { %v437_v0 = vld [vmem:[#allocation11] sm:$0xff] (!%p2405_p3)  ;;  %v438_v1 = vld [vmem:[#allocation11 + $0x8] sm:$0xff] (!%p2405_p3)  ;;  %v3289_v3 = vmov (!%p2405_p3), 0.0|0.0   ;;  %v439_v6 = vld [vmem:[#allocation11 + $0x10] sm:$0xff] (!%p2405_p3)  ;;  %vm770_vm0 = vcmask (!%p2405_p3), 7168   ;;  %vm3290_vm1 = vmmov (!%p2405_p3), 0  }
 0x122   : > { %435 = sbr.rel (%p2405_p3) target bundleno = 523 (0x20b), region = 80  ;;  %v441_v2 = vld [vmem:[#allocation11 + $0x20] sm:$0xff] (!%p2405_p3)  ;;  %2656 = vmatprep.subr.bf16.mxu0 (!%p2405_p3), %v3289_v3  ;;  %2662 = vmatprep.subr.bf16.mxu1 (!%p2405_p3), %v3289_v3  ;;  %v2657_v4 = vpack.c.bf16 (!%p2405_p3), %v438_v1, %v437_v0  ;;  %v442_v5 = vld [vmem:[#allocation11 + $0x28] sm:$0xff] (!%p2405_p3)  ;;  %v440_v7 = vld [vmem:[#allocation11 + $0x18] sm:$0xff] (!%p2405_p3)  ;;  %v3291_v11 = vmov (!%p2405_p3), 0.0   ;;  %v3292_v12 = vmov (!%p2405_p3), -inf  }
 0x123   : > { %v2663_v8 = vpack.c.bf16 (!%p2405_p3), %v442_v5, %v441_v2  ;;  %v443_v9 = vld [vmem:[#allocation11 + $0x30] sm:$0xff] (!%p2405_p3)  ;;  %v444_v10 = vld [vmem:[#allocation11 + $0x38] sm:$0xff] (!%p2405_p3)  ;;  %2516 = vmatprep.mubr.msk.f32.mxu0 (!%p2405_p3), %vm3290_vm1, %v3291_v11  ;;  %771 = vst.msk [vmem:[#allocation3] sm:$0xff] (!%p2405_p3), %vm770_vm0, %v3292_v12  ;;  %772 = vst.msk [vmem:[#allocation3 + $0x8] sm:$0xff] (!%p2405_p3), %vm770_vm0, %v3292_v12  ;;  %2527 = vmatprep.mubr.msk.f32.mxu1 (!%p2405_p3), %vm3290_vm1, %v3291_v11  ;;  %v2660_v13 = vpack.c.bf16 (!%p2405_p3), %v440_v7, %v439_v6  ;;  %vm481_vm2 = vcmask (!%p2405_p3), 261120   ;;  %vm765_vm3 = vcmask (!%p2405_p3), 64512  }
 0x124   : > { %773 = vst.msk [vmem:[#allocation3 + $0x10] sm:$0xff] (!%p2405_p3), %vm770_vm0, %v3292_v12  ;;  %774 = vst.msk [vmem:[#allocation3 + $0x18] sm:$0xff] (!%p2405_p3), %vm770_vm0, %v3292_v12  ;;  %2658 = vmatpush3.bf16.msra.mxu0 (!%p2405_p3), %v2657_v4  ;;  %v2666_v14 = vpack.c.bf16 (!%p2405_p3), %v444_v10, %v443_v9  ;;  %v445_v15 = vld [vmem:[#allocation11 + $0x40] sm:$0xff] (!%p2405_p3)  ;;  %v446_v16 = vld [vmem:[#allocation11 + $0x48] sm:$0xff] (!%p2405_p3) }
 0x125   : > { %775 = vst.msk [vmem:[#allocation4] sm:$0xff] (!%p2405_p3), %vm770_vm0, %v3291_v11  ;;  %776 = vst.msk [vmem:[#allocation4 + $0x8] sm:$0xff] (!%p2405_p3), %vm770_vm0, %v3291_v11  ;;  %2664 = vmatpush3.bf16.msra.mxu1 (!%p2405_p3), %v2663_v8  ;;  %2659 = vmatprep.subr.bf16.mxu0 (!%p2405_p3), %v3289_v3  ;;  %v449_v17 = vld [vmem:[#allocation11 + $0x60] sm:$0xff] (!%p2405_p3)  ;;  %v450_v18 = vld [vmem:[#allocation11 + $0x68] sm:$0xff] (!%p2405_p3)  ;;  %v2669_v20 = vpack.c.bf16 (!%p2405_p3), %v446_v16, %v445_v15 }
 0x126   : > { %777 = vst.msk [vmem:[#allocation4 + $0x10] sm:$0xff] (!%p2405_p3), %vm770_vm0, %v3291_v11  ;;  %778 = vst.msk [vmem:[#allocation4 + $0x18] sm:$0xff] (!%p2405_p3), %vm770_vm0, %v3291_v11  ;;  %2665 = vmatprep.subr.bf16.mxu1 (!%p2405_p3), %v3289_v3  ;;  %v436_v19 = vld [vmem:[%s3720_s24] sm:$0xff] (!%p2405_p3)  ;;  %v2675_v21 = vpack.c.bf16 (!%p2405_p3), %v450_v18, %v449_v17  ;;  %v447_v22 = vld [vmem:[#allocation11 + $0x50] sm:$0xff] (!%p2405_p3) }
 0x127   : > { %v448_v23 = vld [vmem:[#allocation11 + $0x58] sm:$0xff] (!%p2405_p3)  ;;  %v451_v24 = vld [vmem:[#allocation11 + $0x70] sm:$0xff] (!%p2405_p3)  ;;  %779 = vst.msk [vmem:[#allocation5] sm:$0xff] (!%p2405_p3), %vm765_vm3, %v3291_v11  ;;  %780 = vst.msk [vmem:[#allocation5 + $0x8] sm:$0xff] (!%p2405_p3), %vm765_vm3, %v3291_v11 }
 0x128   : > { %2661 = vmatpush3.bf16.msra.mxu0 (!%p2405_p3), %v2660_v13  ;;  %v452_v25 = vld [vmem:[#allocation11 + $0x78] sm:$0xff] (!%p2405_p3)  ;;  %v2672_v26 = vpack.c.bf16 (!%p2405_p3), %v448_v23, %v447_v22  ;;  %781 = vst.msk [vmem:[#allocation5 + $0x10] sm:$0xff] (!%p2405_p3), %vm765_vm3, %v3291_v11  ;;  %782 = vst.msk [vmem:[#allocation5 + $0x18] sm:$0xff] (!%p2405_p3), %vm765_vm3, %v3291_v11  ;;  %v2406_v28 = vld [vmem:[#allocation12] ss:$0 sm:$0xff] (!%p2405_p3) }
 0x129   : > { %2667 = vmatpush3.bf16.msra.mxu1 %v2666_v14  ;;  %2668 = vmatprep.subr.bf16.mxu0 %v3289_v3  ;;  %v2678_v27 = vpack.c.bf16 %v452_v25, %v451_v24  ;;  %v2407_v29 = vld [vmem:[#allocation12 + $0x1] ss:$0 sm:$0xff]  ;;  %v2408_v36 = vld [vmem:[#allocation12 + $0x2] ss:$0 sm:$0xff]  ;;  %v2409_v37 = vld [vmem:[#allocation12 + $0x3] ss:$0 sm:$0xff] }
 0x12a   : > { %2674 = vmatprep.subr.bf16.mxu1 %v3289_v3 }
 0x12b   : > { %2517 = vmatmul.mubr.msk.f32.vlgmr.msra.gmra.mrb[0].mxu0 %vm481_vm2, %v436_v19 }
 0x12c   : > { %2528 = vmatmul.mubr.msk.f32.vlgmr.msra.gmra.mrb[0].mxu1 %vm481_vm2, %v436_v19  ;;  %2670 = vmatpush3.bf16.msra.mxu0 %v2669_v20 }
 0x12d   : > { %2676 = vmatpush3.bf16.msra.mxu1 %v2675_v21  ;;  %2671 = vmatprep.subr.bf16.mxu0 %v3289_v3 }
 0x12e   : > { %2677 = vmatprep.subr.bf16.mxu1 %v3289_v3  ;;  %2538 = vmatprep.mubr.msk.f32.mxu0 %vm3290_vm1, %v3291_v11 }
 0x12f   : > { %2549 = vmatprep.mubr.msk.f32.mxu1 %vm3290_vm1, %v3291_v11 }
 0x130   : > { %2673 = vmatpush3.bf16.msra.mxu0 %v2672_v26 }
 0x131   : > { %2679 = vmatpush3.bf16.msra.mxu1 %v2678_v27 }
 0x133   : > { %2539 = vmatmul.mubr.msk.f32.vlgmr.msra.gmra.mrb[2].mxu0 %vm481_vm2, %v436_v19 }
 0x134   : > { %2550 = vmatmul.mubr.msk.f32.vlgmr.msra.gmra.mrb[2].mxu1 %vm481_vm2, %v436_v19 }
 0x1fe   : > { %v551_v30 = vpop.f32.mrb[0].mxu0 }
 0x1ff   : > { %v552_v31 = vadd.f32 %v2406_v28, %v551_v30  ;;  %v621_v32 = vpop.f32.mrb[0].mxu1  ;;  %v2518_v33 = vpop.f32.mrb[1].mxu0 }
 0x200   : > { %v622_v34 = vadd.f32 %v2407_v29, %v621_v32  ;;  %v2529_v35 = vpop.f32.mrb[1].mxu1 }
 0x201   : > { %766 = vst.msk [vmem:[#allocation2] sm:$0xff] %vm765_vm3, %v552_v31 }
 0x202   : > { %767 = vst.msk [vmem:[#allocation2 + $0x8] sm:$0xff] %vm765_vm3, %v622_v34 }
 0x206   : > { %v691_v38 = vpop.f32.mrb[2].mxu0 }
 0x207   : > { %v692_v39 = vadd.f32 %v2408_v36, %v691_v38  ;;  %v761_v40 = vpop.f32.mrb[2].mxu1  ;;  %v2540_v41 = vpop.f32.mrb[3].mxu0 }
 0x208   : > { %v762_v42 = vadd.f32 %v2409_v37, %v761_v40  ;;  %v2551_v43 = vpop.f32.mrb[3].mxu1 }
 0x209   : > { %768 = vst.msk [vmem:[#allocation2 + $0x10] sm:$0xff] %vm765_vm3, %v692_v39 }
 0x20a   : > { %769 = vst.msk [vmem:[#allocation2 + $0x18] sm:$0xff] %vm765_vm3, %v762_v42 }
 0x20b PF: > { %v784_v44 = vld [vmem:[#allocation14] sm:$0xff]  ;;  %v785_v45 = vld [vmem:[#allocation14 + $0x8] sm:$0xff]  ;;  %v3293_v47 = vmov 0.0|0.0   ;;  %v786_v50 = vld [vmem:[#allocation14 + $0x10] sm:$0xff]  ;;  %vm3294_vm4 = vmmov 0   ;;  %v3295_v53 = vmov 0.0  }
 0x20c   : > { %v788_v46 = vld [vmem:[#allocation14 + $0x20] sm:$0xff]  ;;  %2680 = vmatprep.subr.bf16.mxu0 %v3293_v47  ;;  %v2681_v48 = vpack.c.bf16 %v785_v45, %v784_v44  ;;  %2686 = vmatprep.subr.bf16.mxu1 %v3293_v47  ;;  %v789_v49 = vld [vmem:[#allocation14 + $0x28] sm:$0xff]  ;;  %v787_v51 = vld [vmem:[#allocation14 + $0x18] sm:$0xff]  ;;  %vm828_vm5 = vcmask 261120   ;;  %vm1116_vm6 = vcmask 64512   ;;  %v3296_v39 = vmov 0  }
 0x20d   : > { %v2687_v52 = vpack.c.bf16 %v789_v49, %v788_v46  ;;  %2560 = vmatprep.mubr.msk.f32.mxu0 %vm3294_vm4, %v3295_v53  ;;  %v790_v54 = vld [vmem:[#allocation14 + $0x30] sm:$0xff]  ;;  %v791_v55 = vld [vmem:[#allocation14 + $0x38] sm:$0xff]  ;;  %2571 = vmatprep.mubr.msk.f32.mxu1 %vm3294_vm4, %v3295_v53  ;;  %v2684_v56 = vpack.c.bf16 %v787_v51, %v786_v50  ;;  %v792_v58 = vld [vmem:[#allocation14 + $0x40] sm:$0xff]  ;;  %vm1509_vm7 = vcmask 7168   ;;  %s3297_s14 = smov 120   ;;  %s4038_s23 = sld [smem:[#allocation27_spill]] }
 0x20e   : > { %2682 = vmatpush3.bf16.msra.mxu0 %v2681_v48  ;;  %v2690_v57 = vpack.c.bf16 %v791_v55, %v790_v54  ;;  %v793_v59 = vld [vmem:[#allocation14 + $0x48] sm:$0xff]  ;;  %v796_v60 = vld [vmem:[#allocation14 + $0x60] sm:$0xff]  ;;  %v794_v1 = vld [vmem:[#allocation14 + $0x50] sm:$0xff]  ;;  %2894 = vset.pattern.permute.xlu0 %v3296_v39 }
 0x20f   : > { %2683 = vmatprep.subr.bf16.mxu0 %v3293_v47  ;;  %2688 = vmatpush3.bf16.msra.mxu1 %v2687_v52  ;;  %v797_v61 = vld [vmem:[#allocation14 + $0x68] sm:$0xff]  ;;  %v2693_v63 = vpack.c.bf16 %v793_v59, %v792_v58  ;;  %v795_v2 = vld [vmem:[#allocation14 + $0x58] sm:$0xff]  ;;  %v798_v3 = vld [vmem:[#allocation14 + $0x70] sm:$0xff] }
 0x210   : > { %2689 = vmatprep.subr.bf16.mxu1 %v3293_v47  ;;  %v783_v62 = vld [vmem:[%s376_s20] sm:$0xff]  ;;  %v2699_v0 = vpack.c.bf16 %v797_v61, %v796_v60  ;;  %v2696_v5 = vpack.c.bf16 %v795_v2, %v794_v1  ;;  %v2414_v7 = vld [vmem:[#allocation15] ss:$0 sm:$0xff]  ;;  %v2415_v8 = vld [vmem:[#allocation15 + $0x1] ss:$0 sm:$0xff]  ;;  %2895 = vset.pattern.permute.xlu1 %v3296_v39 }
 0x211   : > { %v799_v4 = vld [vmem:[#allocation14 + $0x78] sm:$0xff]  ;;  %v1113_v16 = vld [vmem:[#allocation2 + $0x8] sm:$0xff]  ;;  %v2416_v17 = vld [vmem:[#allocation15 + $0x2] ss:$0 sm:$0xff] }
 0x212   : > { %2685 = vmatpush3.bf16.msra.mxu0 %v2684_v56  ;;  %v2702_v6 = vpack.c.bf16 %v799_v4, %v798_v3  ;;  %v1112_v15 = vld [vmem:[#allocation2] sm:$0xff]  ;;  %v1114_v25 = vld [vmem:[#allocation2 + $0x10] sm:$0xff]  ;;  %v1115_v26 = vld [vmem:[#allocation2 + $0x18] sm:$0xff] }
 0x213   : > { %2691 = vmatpush3.bf16.msra.mxu1 %v2690_v57  ;;  %2692 = vmatprep.subr.bf16.mxu0 %v3293_v47  ;;  %v2417_v18 = vld [vmem:[#allocation15 + $0x3] ss:$0 sm:$0xff]  ;;  %v1422_v43 = vld [vmem:[#allocation3 + $0x8] sm:$0xff]  ;;  %v3824_v48 = vld [vmem:[#allocation3 + $0x10] sm:$0xff]  ;;  %p2434_p11 = scmp.ne.s32.totalorder %s4038_s23, 3 }
 0x214   : > { %2698 = vmatprep.subr.bf16.mxu1 %v3293_v47  ;;  %v1421_v40 = vld [vmem:[#allocation3] sm:$0xff]  ;;  %v3830_v51 = vld [vmem:[#allocation3 + $0x18] sm:$0xff]  ;;  %vm3300_vm8 = vmmov (!%p2434_p11), 0  }
 0x215   : > { %2561 = vmatmul.mubr.msk.f32.vlgmr.msra.gmra.mrb[0].mxu0 %vm828_vm5, %v783_v62 }
 0x216   : > { %2694 = vmatpush3.bf16.msra.mxu0 %v2693_v63  ;;  %2572 = vmatmul.mubr.msk.f32.vlgmr.msra.gmra.mrb[0].mxu1 %vm828_vm5, %v783_v62 }
 0x217   : > { %2695 = vmatprep.subr.bf16.mxu0 %v3293_v47  ;;  %2700 = vmatpush3.bf16.msra.mxu1 %v2699_v0 }
 0x218   : > { %2582 = vmatprep.mubr.msk.f32.mxu0 %vm3294_vm4, %v3295_v53  ;;  %2701 = vmatprep.subr.bf16.mxu1 %v3293_v47 }
 0x219   : > { %2593 = vmatprep.mubr.msk.f32.mxu1 %vm3294_vm4, %v3295_v53 }
 0x21a   : > { %2697 = vmatpush3.bf16.msra.mxu0 %v2696_v5 }
 0x21b   : > { %2703 = vmatpush3.bf16.msra.mxu1 %v2702_v6  ;;  %2596 = vmatprep.subr.mxu0 %v3295_v53 }
 0x21c   : > { %2601 = vmatprep.subr.mxu1 %v3295_v53 }
 0x21d   : > { %2583 = vmatmul.mubr.msk.f32.vlgmr.msra.gmra.mrb[2].mxu0 %vm828_vm5, %v783_v62 }
 0x21e   : > { %2594 = vmatmul.mubr.msk.f32.vlgmr.msra.gmra.mrb[2].mxu1 %vm828_vm5, %v783_v62  ;;  %2598 = vmatprep.mubr.msk.f32.mxu0 %vm3294_vm4, %v3295_v53 }
 0x21f   : > { %2603 = vmatprep.mubr.msk.f32.mxu1 %vm3294_vm4, %v3295_v53 }
 0x2e8   : > { %v898_v9 = vpop.f32.mrb[0].mxu0 }
 0x2e9   : > { %v3787_v10 = vadd.f32 %v2414_v7, %v898_v9  ;;  %v2562_v11 = vpop.f32.mrb[1].mxu0  ;;  %v968_v12 = vpop.f32.mrb[0].mxu1 }
 0x2ea   : > { %v3789_v13 = vadd.f32 %v2415_v8, %v968_v12  ;;  %v2573_v14 = vpop.f32.mrb[1].mxu1 }
 0x2eb   : > { %2597 = vmatpush3.xpose.msk.msra.mxu0 %vm1116_vm6, %v3787_v10 }
 0x2ec   : > { %2602 = vmatpush3.xpose.msk.msra.mxu1 %vm1116_vm6, %v3789_v13  ;;  %2606 = vmatprep.subr.mxu0 %v3295_v53 }
 0x2ed   : > { %2611 = vmatprep.subr.mxu1 %v3295_v53 }
 0x2ee   : > { %2599 = vmatmul.mubr.msk.f32.vlgmr.msra.gmra.mrb[4].mxu0 %vm1116_vm6, %v1112_v15 }
 0x2ef   : > { %2604 = vmatmul.mubr.msk.f32.vlgmr.msra.gmra.mrb[4].mxu1 %vm1116_vm6, %v1113_v16  ;;  %2608 = vmatprep.mubr.msk.f32.mxu0 %vm3294_vm4, %v3295_v53 }
 0x2f0   : > { %v1038_v19 = vpop.f32.mrb[2].mxu0  ;;  %2613 = vmatprep.mubr.msk.f32.mxu1 %vm3294_vm4, %v3295_v53 }
 0x2f1   : > { %v3803_v20 = vadd.f32 %v2416_v17, %v1038_v19  ;;  %v2584_v21 = vpop.f32.mrb[3].mxu0  ;;  %v1108_v22 = vpop.f32.mrb[2].mxu1 }
 0x2f2   : > { %v3805_v23 = vadd.f32 %v2417_v18, %v1108_v22  ;;  %v2595_v24 = vpop.f32.mrb[3].mxu1 }
 0x2f3   : > { %2607 = vmatpush3.xpose.msk.msra.mxu0 %vm1116_vm6, %v3803_v20 }
 0x2f4   : > { %2612 = vmatpush3.xpose.msk.msra.mxu1 %vm1116_vm6, %v3805_v23  ;;  %2616 = vmatprep.subr.mxu0 %v3295_v53 }
 0x2f5   : > { %2621 = vmatprep.subr.mxu1 %v3295_v53 }
 0x2f6   : > { %2609 = vmatmul.mubr.msk.f32.vlgmr.msra.gmra.mrb[6].mxu0 %vm1116_vm6, %v1114_v25  ;;  %v1485_v25 = vld [vmem:[#allocation4] sm:$0xff] }
 0x2f7   : > { %2614 = vmatmul.mubr.msk.f32.vlgmr.msra.gmra.mrb[6].mxu1 %vm1116_vm6, %v1115_v26  ;;  %2618 = vmatprep.mubr.msk.f32.mxu0 %vm3294_vm4, %v3295_v53 }
 0x2f8   : > { %2623 = vmatprep.mubr.msk.f32.mxu1 %vm3294_vm4, %v3295_v53 }
 0x3c1   : > { %v1189_v27 = vpop.f32.mrb[4].mxu0 }
 0x3c2   : > { %v2600_v28 = vpop.f32.mrb[5].mxu0  ;;  %v1425_v29 = vsel %vm1116_vm6, %v1189_v27, -inf  ;;  %v1265_v30 = vpop.f32.mrb[4].mxu1 }
 0x3c3   : > { %1426 = vmax.xlane.f32.xlu0 %v1425_v29  ;;  %v2605_v31 = vpop.f32.mrb[5].mxu1  ;;  %v1428_v32 = vsel %vm1116_vm6, %v1265_v30, -inf  ;;  %v1486_v29 = vld [vmem:[#allocation4 + $0x8] sm:$0xff] }
 0x3c7   : > { %1429 = vmax.xlane.f32.xlu0 %v1428_v32 }
 0x3c9   : > { %v1341_v33 = vpop.f32.mrb[6].mxu0 }
 0x3ca   : > { %v2610_v34 = vpop.f32.mrb[7].mxu0  ;;  %v1431_v35 = vsel %vm1116_vm6, %v1341_v33, -inf  ;;  %v1417_v36 = vpop.f32.mrb[6].mxu1 }
 0x3cb   : > { %1432 = vmax.xlane.f32.xlu1 %v1431_v35  ;;  %v2615_v37 = vpop.f32.mrb[7].mxu1  ;;  %v1434_v38 = vsel %vm1116_vm6, %v1417_v36, -inf }
 0x3cc   : > { %v1488_v37 = vld [vmem:[#allocation4 + $0x18] sm:$0xff] }
 0x3cf   : > { %1435 = vmax.xlane.f32.xlu1 %v1434_v38 }
 0x450   : > { %v1427_v41 = vpop.xlane.xlu0 %1426 }
 0x451   : > { %v1437_v42 = vmax.f32 %v1421_v40, %v1427_v41 }
 0x453   : > { %v1441_v44 = vsub.f32 %v1421_v40, %v1437_v42  ;;  %1854 = vst.msk [vmem:[#allocation3] sm:$0xff] %vm1509_vm7, %v1437_v42  ;;  %1455 = vperm.xlu0 %2894, %v1437_v42   ;;  %v1514_v42 = vld [vmem:[#allocation5] sm:$0xff] }
 0x454   : > { %v1430_v45 = vpop.xlane.xlu0 %1429 }
 0x455   : > { %v1445_v46 = vmul.f32 1.442695, %v1441_v44  ;;  %v1438_v47 = vmax.f32 %v1422_v43, %v1430_v45  ;;  %v1515_v44 = vld [vmem:[#allocation5 + $0x8] sm:$0xff] }
 0x457   : > { %2896 = vpow2.f32 %v1445_v46  ;;  %1855 = vst.msk [vmem:[#allocation3 + $0x8] sm:$0xff] %vm1509_vm7, %v1438_v47  ;;  %1460 = vperm.xlu1 %2895, %v1438_v47   ;;  %v1442_v57 = vsub.f32 %v1422_v43, %v1438_v47 }
 0x458   : > { %v1433_v49 = vpop.xlane.xlu1 %1432 }
 0x459   : > { %v3828_v50 = vmax.f32 %v3824_v48, %v1433_v49  ;;  %v1447_v59 = vmul.f32 1.442695, %v1442_v57  ;;  %v1516_v49 = vld [vmem:[#allocation5 + $0x10] sm:$0xff] }
 0x45b   : > { %v1443_v52 = vsub.f32 %v3824_v48, %v3828_v50  ;;  %1856 = vst.msk [vmem:[#allocation3 + $0x10] sm:$0xff] %vm1509_vm7, %v3828_v50  ;;  %1465 = vperm.xlu1 %2895, %v3828_v50   ;;  %2898 = vpow2.f32 %v1447_v59 }
 0x45c   : > { %v1436_v54 = vpop.xlane.xlu1 %1435 }
 0x45d   : > { %v1440_v55 = vmax.f32 %v3830_v51, %v1436_v54  ;;  %v1449_v21 = vmul.f32 1.442695, %v1443_v52 }
 0x45f   : > { %v1444_v56 = vsub.f32 %v3830_v51, %v1440_v55  ;;  %1857 = vst.msk [vmem:[#allocation3 + $0x18] sm:$0xff] %vm1509_vm7, %v1440_v55  ;;  %1470 = vperm.xlu1 %2895, %v1440_v55  }
 0x461   : > { %v3840_v58 = vpop.eup %2896 }
 0x462   : > { %1520 = vperm.xlu0 %2894, %v3840_v58   ;;  %v1489_v26 = vmul.f32 %v3840_v58, %v1485_v25 }
 0x463   : > { %1542 = vrot.lane.b32.xlu1 %v3787_v10, %s3297_s14 }
 0x465   : > { %v2899_v60 = vpop.eup %2898 }
 0x466   : > { %v1490_v31 = vmul.f32 %v2899_v60, %v1486_v29 }
 0x467   : > { %1618 = vrot.lane.b32.xlu1 %v3789_v13, %s3297_s14 }
 0x46b   : > { %1694 = vrot.lane.b32.xlu1 %v3803_v20, %s3297_s14 }
 0x46f   : > { %1770 = vrot.lane.b32.xlu1 %v3805_v23, %s3297_s14 }
 0x473   : > { %1525 = vperm.xlu1 %2895, %v2899_v60  }
 0x4d2   : > { %v1456_v61 = vpop.permute.xlu0 %1455 }
 0x4d3   : > { %v1473_v62 = vsub.f32 %v1189_v27, %v1456_v61 }
 0x4d5   : > { %v1477_v63 = vmul.f32 1.442695, %v1473_v62 }
 0x4d6   : > { %v1461_v0 = vpop.permute.xlu1 %1460 }
 0x4d7   : > { %2900 = vpow2.f32 %v1477_v63  ;;  %v1474_v1 = vsub.f32 %v1265_v30, %v1461_v0 }
 0x4d9   : > { %v1479_v2 = vmul.f32 1.442695, %v1474_v1 }
 0x4da   : > { %v1466_v3 = vpop.permute.xlu1 %1465 }
 0x4db   : > { %2902 = vpow2.f32 %v1479_v2  ;;  %v1475_v4 = vsub.f32 %v1341_v33, %v1466_v3  ;;  %v1487_v33 = vld [vmem:[#allocation4 + $0x10] sm:$0xff] }
 0x4dd   : > { %v1481_v5 = vmul.f32 1.442695, %v1475_v4  ;;  %v3298_v4 = vmov (!%p2434_p11), 0  }
 0x4de   : > { %v1471_v6 = vpop.permute.xlu1 %1470 }
 0x4df   : > { %2904 = vpow2.f32 %v1481_v5  ;;  %v1476_v7 = vsub.f32 %v1417_v36, %v1471_v6 }
 0x4e1   : > { %v2901_v8 = vpop.eup %2900  ;;  %v1483_v9 = vmul.f32 1.442695, %v1476_v7  ;;  %v1521_v27 = vpop.permute.xlu0 %1520 }
 0x4e2   : > { %v1543_v10 = vpop.permute.xlu1 %1542  ;;  %v1493_v11 = vsel %vm1116_vm6, %v2901_v8, 0.0  ;;  %v1538_v43 = vmul.f32 %v1521_v27, %v1514_v42 }
 0x4e3   : > { %2906 = vpow2.f32 %v1483_v9  ;;  %1494 = vadd.xlane.f32.xlu1 %v1493_v11  ;;  %2617 = vmatpush3.msra.mxu0 %v1543_v10  ;;  %v3299_v9 = vmov (!%p2434_p11), 0.0   ;;  %v1898_v10 = vld [vmem:[#allocation17] sm:$0xff] (!%p2434_p11) }
 0x4e4   : > { %2619 = vmatmul.mubr.msk.f32.vlgmr.msra.gmra.mrb[8].mxu0 %vm1116_vm6, %v2901_v8  ;;  %2626 = vmatprep.subr.mxu0 %v3295_v53  ;;  %2908 = vpow2.f32 %v1449_v21 }
 0x4e5   : > { %v2903_v12 = vpop.eup %2902  ;;  %2628 = vmatprep.mubr.msk.f32.mxu0 %vm3294_vm4, %v3295_v53 }
 0x4e6   : > { %v1619_v13 = vpop.permute.xlu1 %1618  ;;  %v1496_v14 = vsel %vm1116_vm6, %v2903_v12, 0.0 }
 0x4e7   : > { %1497 = vadd.xlane.f32.xlu0 %v1496_v14  ;;  %2622 = vmatpush3.msra.mxu1 %v1619_v13 }
 0x4e8   : > { %2624 = vmatmul.mubr.msk.f32.vlgmr.msra.gmra.mrb[8].mxu1 %vm1116_vm6, %v2903_v12  ;;  %2631 = vmatprep.subr.mxu1 %v3295_v53  ;;  %v1899_v12 = vld [vmem:[#allocation17 + $0x8] sm:$0xff] (!%p2434_p11) }
 0x4e9   : > { %v2905_v15 = vpop.eup %2904  ;;  %2633 = vmatprep.mubr.msk.f32.mxu1 %vm3294_vm4, %v3295_v53  ;;  %v1451_v53 = vmul.f32 1.442695, %v1444_v56  ;;  %v1517_v56 = vld [vmem:[#allocation5 + $0x18] sm:$0xff] }
 0x4ea   : > { %v1695_v16 = vpop.permute.xlu1 %1694  ;;  %v1499_v17 = vsel %vm1116_vm6, %v2905_v15, 0.0 }
 0x4eb   : > { %1500 = vadd.xlane.f32.xlu0 %v1499_v17  ;;  %2627 = vmatpush3.msra.mxu0 %v1695_v16  ;;  %2910 = vpow2.f32 %v1451_v53 }
 0x4ec   : > { %2629 = vmatmul.mubr.msk.f32.vlgmr.msra.gmra.mrb[10].mxu0 %vm1116_vm6, %v2905_v15  ;;  %2636 = vmatprep.subr.mxu0 (!%p2434_p11), %v3299_v9 }
 0x4ed   : > { %v2907_v18 = vpop.eup %2906  ;;  %2637 = vmatpush3.msra.mxu0 (!%p2434_p11), %v1898_v10  ;;  %2638 = vmatprep.mubr.msk.f32.mxu0 (!%p2434_p11), %vm3300_vm8, %v3299_v9 }
 0x4ee   : > { %v1771_v19 = vpop.permute.xlu1 %1770  ;;  %v1502_v20 = vsel %vm1116_vm6, %v2907_v18, 0.0  ;;  %v2909_v22 = vpop.eup %2908  ;;  %2646 = vmatprep.subr.mxu0 (!%p2434_p11), %v3299_v9 }
 0x4ef   : > { %1503 = vadd.xlane.f32.xlu1 %v1502_v20  ;;  %2632 = vmatpush3.msra.mxu1 %v1771_v19  ;;  %v1491_v35 = vmul.f32 %v2909_v22, %v1487_v33 }
 0x4f0   : > { %2634 = vmatmul.mubr.msk.f32.vlgmr.msra.gmra.mrb[10].mxu1 %vm1116_vm6, %v2907_v18  ;;  %2641 = vmatprep.subr.mxu1 (!%p2434_p11), %v3299_v9  ;;  %v1900_v18 = vld [vmem:[#allocation17 + $0x10] sm:$0xff] (!%p2434_p11) }
 0x4f1   : > { %2643 = vmatprep.mubr.msk.f32.mxu1 (!%p2434_p11), %vm3300_vm8, %v3299_v9  ;;  %2642 = vmatpush3.msra.mxu1 (!%p2434_p11), %v1899_v12 }
 0x4f2   : > { %v1526_v24 = vpop.permute.xlu1 %1525  ;;  %2651 = vmatprep.subr.mxu1 (!%p2434_p11), %v3299_v9 }
 0x4f3   : > { %v1539_v48 = vmul.f32 %v1526_v24, %v1515_v44 }
 0x4f5   : > { %v2911_v23 = vpop.eup %2910 }
 0x4f6   : > { %v1492_v39 = vmul.f32 %v2911_v23, %v1488_v37 }
 0x500   : > { %1530 = vperm.xlu1 %2895, %v2909_v22   ;;  %v1901_v22 = vld [vmem:[#allocation17 + $0x18] sm:$0xff] (!%p2434_p11) }
 0x501   : > { %1535 = vperm.xlu0 %2894, %v2911_v23  }
 0x504   : > { %2913 = vset.pattern.permute.xlu1 (!%p2434_p11), %v3298_v4 }
 0x505   : > { %2912 = vset.pattern.permute.xlu0 (!%p2434_p11), %v3298_v4 }
 0x570   : > { %v1495_v28 = vpop.xlane.xlu1 %1494 }
 0x571   : > { %v1505_v30 = vadd.f32 %v1495_v28, %v1489_v26 }
 0x573   : > { %1510 = vst.msk [vmem:[#allocation4] sm:$0xff] %vm1509_vm7, %v1505_v30 }
 0x574   : > { %v1498_v32 = vpop.xlane.xlu0 %1497 }
 0x575   : > { %v1506_v34 = vadd.f32 %v1498_v32, %v1490_v31 }
 0x577   : > { %1511 = vst.msk [vmem:[#allocation4 + $0x8] sm:$0xff] %vm1509_vm7, %v1506_v34 }
 0x578   : > { %v1501_v36 = vpop.xlane.xlu0 %1500 }
 0x579   : > { %v1507_v38 = vadd.f32 %v1501_v36, %v1491_v35 }
 0x57a   : > { %v1862_v2 = vld [vmem:[#allocation4] sm:$0xff] (!%p2434_p11) }
 0x57b   : > { %1512 = vst.msk [vmem:[#allocation4 + $0x10] sm:$0xff] %vm1509_vm7, %v1507_v38 }
 0x57c   : > { %v1504_v40 = vpop.xlane.xlu1 %1503 }
 0x57d   : > { %v1508_v41 = vadd.f32 %v1504_v40, %v1492_v39 }
 0x57e   : > { %v1863_v5 = vld [vmem:[#allocation4 + $0x8] sm:$0xff] (!%p2434_p11) }
 0x57f   : > { %1513 = vst.msk [vmem:[#allocation4 + $0x18] sm:$0xff] %vm1509_vm7, %v1508_v41 }
 0x580   : > { %v1531_v50 = vpop.permute.xlu1 %1530  ;;  %v1536_v57 = vpop.permute.xlu0 %1535 }
 0x581   : > { %v1540_v55 = vmul.f32 %v1531_v50, %v1516_v49  ;;  %v1541_v61 = vmul.f32 %v1536_v57, %v1517_v56 }
 0x582   : > { %v1864_v1 = vld [vmem:[#allocation4 + $0x10] sm:$0xff] (!%p2434_p11) }
 0x583   : > { %2914 = vrcp.f32 (!%p2434_p11), %v1864_v1 }
 0x584   : > { %2916 = vrcp.f32 (!%p2434_p11), %v1862_v2 }
 0x586   : > { %v1865_v3 = vld [vmem:[#allocation4 + $0x18] sm:$0xff] (!%p2434_p11) }
 0x587   : > { %2918 = vrcp.f32 (!%p2434_p11), %v1865_v3 }
 0x588   : > { %2920 = vrcp.f32 (!%p2434_p11), %v1863_v5 }
 0x58d   : > { %v2915_v6 = vpop.eup (!%p2434_p11), %2914 }
 0x58e   : > { %v2917_v7 = vpop.eup (!%p2434_p11), %2916  ;;  %1886 = vperm.xlu1 (!%p2434_p11), %2913, %v2915_v6  }
 0x58f   : > { %1876 = vperm.xlu0 (!%p2434_p11), %2912, %v2917_v7  }
 0x591   : > { %v2919_v8 = vpop.eup (!%p2434_p11), %2918 }
 0x592   : > { %v2921_v11 = vpop.eup (!%p2434_p11), %2920  ;;  %1891 = vperm.xlu1 (!%p2434_p11), %2913, %v2919_v8  }
 0x593   : > { %1881 = vperm.xlu0 (!%p2434_p11), %2912, %v2921_v11  }
 0x5b7   : > { %v1614_v45 = vpop.f32.mrb[8].mxu0 }
 0x5b8   : > { %v1846_v46 = vadd.f32 %v1614_v45, %v1538_v43  ;;  %v2620_v47 = vpop.f32.mrb[9].mxu0 }
 0x5ba   : > { %1850 = vst.msk [vmem:[#allocation5] sm:$0xff] %vm1116_vm6, %v1846_v46 }
 0x5bb   : > { %v1690_v51 = vpop.f32.mrb[8].mxu1 }
 0x5bc   : > { %v1847_v52 = vadd.f32 %v1690_v51, %v1539_v48  ;;  %v2625_v54 = vpop.f32.mrb[9].mxu1 }
 0x5be   : > { %1851 = vst.msk [vmem:[#allocation5 + $0x8] sm:$0xff] %vm1116_vm6, %v1847_v52 }
 0x5bf   : > { %v1766_v58 = vpop.f32.mrb[10].mxu0 }
 0x5c0   : > { %v1848_v59 = vadd.f32 %v1766_v58, %v1540_v55  ;;  %v2630_v60 = vpop.f32.mrb[11].mxu0  ;;  %1861 = sbr.rel (%p2434_p11) target bundleno = 1777 (0x6f1), region = 84 }
 0x5c1   : > { %v1870_v13 = vld [vmem:[#allocation5] sm:$0xff] (!%p2434_p11) }
 0x5c2   : > { %1852 = vst.msk [vmem:[#allocation5 + $0x10] sm:$0xff] %vm1116_vm6, %v1848_v59 }
 0x5c3   : > { %v1842_v62 = vpop.f32.mrb[10].mxu1 }
 0x5c4   : > { %v1849_v63 = vadd.f32 %v1842_v62, %v1541_v61  ;;  %v2635_v0 = vpop.f32.mrb[11].mxu1 }
 0x5c5   : > { %v1871_v19 = vld [vmem:[#allocation5 + $0x8] sm:$0xff] (!%p2434_p11) }
 0x5c6   : > { %1853 = vst.msk [vmem:[#allocation5 + $0x18] sm:$0xff] %vm1116_vm6, %v1849_v63 }
 0x5c9   : > { %v1872_v14 = vld [vmem:[#allocation5 + $0x10] sm:$0xff] }
 0x5cd   : > { %v1873_v23 = vld [vmem:[#allocation5 + $0x18] sm:$0xff] }
 0x60d   : > { %v1887_v15 = vpop.permute.xlu1 %1886 }
 0x60e   : > { %v1877_v16 = vpop.permute.xlu0 %1876  ;;  %v1896_v20 = vmul.f32 %v1887_v15, %v1872_v14 }
 0x60f   : > { %v1894_v17 = vmul.f32 %v1877_v16, %v1870_v13 }
 0x611   : > { %2639 = vmatmul.mubr.msk.f32.vlgmr.msra.gmra.mrb[0].mxu0 %vm1116_vm6, %v1894_v17  ;;  %v1892_v24 = vpop.permute.xlu1 %1891 }
 0x612   : > { %v1882_v21 = vpop.permute.xlu0 %1881  ;;  %2647 = vmatpush3.msra.mxu0 %v1900_v18  ;;  %2648 = vmatprep.mubr.msk.f32.mxu0 %vm3300_vm8, %v3299_v9  ;;  %v1897_v25 = vmul.f32 %v1892_v24, %v1873_v23 }
 0x613   : > { %v1895_v53 = vmul.f32 %v1882_v21, %v1871_v19 }
 0x615   : > { %2644 = vmatmul.mubr.msk.f32.vlgmr.msra.gmra.mrb[0].mxu1 %vm1116_vm6, %v1895_v53  ;;  %2649 = vmatmul.mubr.msk.f32.vlgmr.msra.gmra.mrb[2].mxu0 %vm1116_vm6, %v1896_v20 }
 0x616   : > { %2652 = vmatpush3.msra.mxu1 %v1901_v22  ;;  %2653 = vmatprep.mubr.msk.f32.mxu1 %vm3300_vm8, %v3299_v9 }
 0x619   : > { %2654 = vmatmul.mubr.msk.f32.vlgmr.msra.gmra.mrb[2].mxu1 %vm1116_vm6, %v1897_v25 }
 0x6e4   : > { %v1971_v26 = vpop.f32.mrb[0].mxu0 }
 0x6e5   : > { %v2640_v27 = vpop.f32.mrb[1].mxu0  ;;  %v2194_v30 = vsel %vm828_vm5, %v1971_v26, 0.0 }
 0x6e8   : > { %v2044_v28 = vpop.f32.mrb[0].mxu1  ;;  %v2117_v29 = vpop.f32.mrb[2].mxu0 }
 0x6e9   : > { %v2195_v31 = vsel %vm828_vm5, %v2044_v28, 0.0  ;;  %v2645_v32 = vpop.f32.mrb[1].mxu1  ;;  %v2650_v33 = vpop.f32.mrb[3].mxu0  ;;  %v2197_v35 = vsel %vm828_vm5, %v2117_v29, 0.0 }
 0x6ea   : > { %v2196_v34 = vadd.f32 %v2195_v31, %v2194_v30 }
 0x6ec   : > { %v2198_v36 = vadd.f32 %v2197_v35, %v2196_v34  ;;  %v2190_v37 = vpop.f32.mrb[2].mxu1 }
 0x6ed   : > { %v2199_v38 = vsel %vm828_vm5, %v2190_v37, 0.0  ;;  %v2655_v39 = vpop.f32.mrb[3].mxu1 }
 0x6ee   : > { %v2200_v40 = vadd.f32 %v2199_v38, %v2198_v36 }
 0x6f0   : > { %2201 = vst.msk [vmem:[%s3747_s7] sm:$0xff] %vm828_vm5, %v2200_v40 }
 0x6f1 PF: > { %s4039_s15 = sld [smem:[#allocation29_spill]]  ;;  %s4040_s27 = sld [smem:[#allocation28_spill]] }
 0x6f2   : > { %s2218_s1 = sshll.u32 %s3747_s7, 4  ;;  %s4041_s19 = sld [smem:[#allocation40_spill]]  ;;  %s3891_s1 = int_to_ptr.vmem [resolvable:$true] %s2218_s1 }
 0x6f3   : > { %s2203_s4 = scalar_lea.sflag [#allocation8], %s3716_s16  ;;  %s3122_s20 = scalar_lea.vmem %s3891_s1, 128 }
 0x6f4   : > { %p3123_p13 = scmp.ne.s32.totalorder %s3891_s1, %s3122_s20  ;;  %p4042_p5 = scmp.ne.s32.totalorder %s4015_s17, 0 }
 0x6f5   : > { %s3301_s22 = smov [#allocation18]  }
 0x6f6   : > { %p3124_p0 = pnand %p3123_p13, %p4042_p5  ;;  %s3126_s14 = sshll.u32 %s3301_s22, 4  ;;  %s3127_s14 = int_to_ptr.vmem [resolvable:$false] %s3126_s14 }
 0x6f7   : > { %s2440_s30 = sshll.u32 %s4039_s15, 2  ;;  %s3128_s7 = scalar_lea.vmem %s3127_s14, 256 }
 0x6f8   : > { %s2214_s18 = sadd.s32 %s4040_s27, %s2440_s30  ;;  %p3125_p4 = pneg %p3124_p0 }
 0x6f9   : > { %s2441_s21 = sshll.u32 %s2214_s18, 7  ;;  %p3129_p2 = scmp.lt.s32.totalorder %s3891_s1, %s3127_s14 }
 0x6fa   : > { %s2216_s2 = scalar_lea.hbm %s4041_s19, %s2441_s21  ;;  %p3130_p7 = scmp.lt.s32.totalorder %s3128_s7, %s3122_s20 }
 0x6fc   : > { %p3131_p6 = por %p3130_p7, %p3129_p2 }
 0x6fe   : > { %p3132_p10 = pnand %p3131_p6, %p3125_p4 }
 0x700   : > { %3135 = shalt.err (!%p3132_p10)
}
 0x701   : > { %s3136_s23 = scalar_lea.hbm %s2216_s2, 128  ;;  %s3140_s27 = scalar_lea.hbm %s4041_s19, 1024 }
 0x702   : > { %p3137_p8 = scmp.ne.s32.totalorder %s2216_s2, %s3136_s23  ;;  %p3141_p12 = scmp.lt.u32.totalorder %s2216_s2, %s4041_s19 }
 0x703   : > { %p3142_p3 = scmp.lt.u32.totalorder %s3140_s27, %s3136_s23  ;;  %p3144_p13 = scmp.lt.u32.totalorder %s3136_s23, %s2216_s2 }
 0x704   : > { %p3138_p1 = pnand %p3137_p8, %p4042_p5 }
 0x705   : > { %p3143_p11 = por %p3142_p3, %p3141_p12 }
 0x706   : > { %p3139_p9 = pneg %p3138_p1 }
 0x707   : > { %p3145_p0 = por %p3144_p13, %p3143_p11 }
 0x709   : > { %p3146_p4 = pnand %p3145_p0, %p3139_p9 }
 0x70b   : > { %3149 = shalt.err (!%p3146_p4)
}
 0x70c   : > { %2728 = dma.vmem_to_hbm [thread:$0]  (%p4042_p5), %s3891_s1, 128, %s2216_s2, %s2203_s4  }
 0x70d PF: > { %s4043_s21 = sld [smem:[#allocation26_spill]]  ;;  %s4044_s24 = sld [smem:[#allocation33_spill]] }
 0x70e   : > { %p2768_p2 = scmp.ge.s32.totalorder %s3276_s13, 2 }
 0x713   : > { %s2230_s8 = sand.u32 1, %s4043_s21   ;;  %p4045_p7 = scmp.ne.s32.totalorder %s4044_s24, 0 }
 0x714   : > { %s2231_s20 = scalar_lea.sflag [#allocation8], %s2230_s8 }
 0x715   : > { %p2754_p6 = pnand %p2768_p2, %p4045_p7 }
 0x717   : > { %3223 = dma.done.wait (!%p2754_p6), %s2231_s20, 128  }
 0x718   : > { %3225 = vsyncadd (!%p2754_p6), %s2231_s20, 4294967168  ;;  %s28_s13 = sadd.s32 1, %s3276_s13   ;;  %s4047_s17 = sld [smem:[#allocation31_spill]] }
 0x719   : > { %p3918_p10 = scmp.ge.s32.totalorder %s28_s13, 34   ;;  %s4048_s1 = sld [smem:[#allocation32_spill]] }
 0x71a   : > { %s4049_s2 = smov %s4071_s9  ;;  %s4050_s24 = smov %s3232_s25 }
 0x71b   : > { %s4051_s25 = smov %s3236_s26  ;;  %s4052_s26 = smov %s3658_s5 }
 0x71c   : > { %s4053_s27 = smov %s3244_s28  ;;  %s4054_s28 = smov %s3248_s29 }
 0x71d   : > { %s4055_s29 = smov %s3608_s3  ;;  %s4056_s30 = smov %s3264_s10 }
 0x71e   : > { %s4057_s8 = smov %s3268_s11  ;;  %s4058_s9 = smov %s3272_s12 }
 0x71f   : > { %s4059_s10 = smov %s4047_s17  ;;  %s4060_s11 = smov %s4048_s1 }
 0x720   : > { %s4061_s12 = smov %s4049_s2  ;;  %27 = sbr.rel (!%p3918_p10) target bundleno = 22 (0x16), region = 134 }
 0x727   :  { %2236 = vsyncpa [#allocation7], 1 }
 0x728   :  { %2238 = vsyncpa [#allocation7 + $0x1], 1 }
 0x729   :  { %2239 = vsyncpa [#allocation10], 1 }
 0x72a   :  { %2241 = vsyncpa [#allocation10 + $0x1], 1 }
 0x72b   :  { %2242 = vsyncpa [#allocation13], 1 }
 0x72c   :  { %2243 = vsyncpa [#allocation16], 1 }
 0x72d   :  { %2244 = vsyncpa [#allocation8], 1 }
 0x72e   :  { %2246 = vsyncpa [#allocation8 + $0x1], 1 }

</bundles_post_ra>
